<compile_context>
chip_gen: v7x
topology: tpu7x:2x2x1
jax: 0.10.0
libtpu: 0.0.40
codegen_flags: <defaults>
</compile_context>

<pallas_src>
import numpy as np
import jax
import jax.numpy as jnp
from jax import lax
from jax.experimental import pallas as pl
from jax.experimental.pallas import tpu as pltpu

HIDDEN1_SIZE = 75
H_PAD = 128          # hidden dim padded to 128 so the layer-2 contraction is aligned


def _round_up(x: int, m: int) -> int:
    return ((x + m - 1) // m) * m


# ----------------------------------------------------------------------------
# Trellis helper (same semantics as the original python_code helper).
# ----------------------------------------------------------------------------
def create_transition_table(n_states: int) -> np.ndarray:
    return np.concatenate([np.arange(n_states), np.arange(n_states)]).reshape(
        n_states, 2
    )


# ----------------------------------------------------------------------------
# Kernel 1: the DNN producing the per-symbol priors (lane-dense layout).
#   y:  [1, tile_n]   (samples on lanes)
#   h = relu(w1_col * y + b1_col)           -> [H_PAD, tile_n]
#   out = w2t @ h + b2_col                  -> [S, tile_n]   (samples on lanes)
# ----------------------------------------------------------------------------
def mlp_kernel(y_ref, w1_ref, b1_ref, w2_ref, b2_ref, o_ref):
    y = y_ref[...]                                              # [1, tile_n]
    h = jnp.maximum(w1_ref[...] * y + b1_ref[...], 0.0)         # [H_PAD, tile_n]
    o_ref[...] = (
        jnp.dot(w2_ref[...], h, preferred_element_type=jnp.float32)
        + b2_ref[...]
    )                                                           # [S, tile_n]


def _prep_params(params):
    """params = (w1 [1,H], b1 [1,H], w2 [H,S], b2 [1,S]) -> padded column/row forms."""
    w1, b1, w2, b2 = params
    H = w1.shape[1]
    S = w2.shape[1]
    pad_h = H_PAD - H
    w1c = jnp.pad(jnp.asarray(w1, jnp.float32).reshape(H, 1), ((0, pad_h), (0, 0)))
    b1c = jnp.pad(jnp.asarray(b1, jnp.float32).reshape(H, 1), ((0, pad_h), (0, 0)))
    w2t = jnp.pad(jnp.asarray(w2, jnp.float32).T, ((0, 0), (0, pad_h)))   # [S, H_PAD]
    b2c = jnp.asarray(b2, jnp.float32).reshape(S, 1)
    return w1c, b1c, w2t, b2c


def mlp_priors_flat(y, params, *, tile_n=2048):
    """y: [B, T] float -> priors in [S, B*T] layout (batch-major flatten)."""
    B, T = y.shape
    w1c, b1c, w2t, b2c = _prep_params(params)
    S = w2t.shape[0]
    N = B * T
    tile_n = int(min(tile_n, _round_up(N, 128)))
    Np = _round_up(N, tile_n)

    y_flat = y.reshape(1, N).astype(jnp.float32)
    if Np != N:
        y_flat = jnp.pad(y_flat, ((0, 0), (0, Np - N)))

    out = pl.pallas_call(
        mlp_kernel,
        out_shape=jax.ShapeDtypeStruct((S, Np), jnp.float32),
        grid=(Np // tile_n,),
        in_specs=[
            pl.BlockSpec((1, tile_n), lambda i: (0, i)),
            pl.BlockSpec((H_PAD, 1), lambda i: (0, 0)),
            pl.BlockSpec((H_PAD, 1), lambda i: (0, 0)),
            pl.BlockSpec((S, H_PAD), lambda i: (0, 0)),
            pl.BlockSpec((S, 1), lambda i: (0, 0)),
        ],
        out_specs=pl.BlockSpec((S, tile_n), lambda i: (0, i)),
        compiler_params=pltpu.CompilerParams(dimension_semantics=("parallel",)),
    )(y_flat, w1c, b1c, w2t, b2c)

    return out[:, :N]                       # [S, N] with n = b*T + t


# ----------------------------------------------------------------------------
# Kernel 2: 'val'-phase Viterbi ACS recursion (states on sublanes, batch on
# lanes, priors streamed time-major with the path metric carried in scratch).
# ----------------------------------------------------------------------------
def make_viterbi_kernel(tt: np.ndarray, tile_t: int, unroll: int):
    S = int(tt.shape[0])

    def viterbi_kernel(p_ref, det_ref, inprob_ref):
        # p_ref:   [tile_t, S, B]  priors for this time tile
        # det_ref: [tile_t, B]     detected bits (VMEM-resident, DMA'd out per tile)
        # inprob_ref: [S, B]       path metric carried across T-tiles

        @pl.when(pl.program_id(0) == 0)
        def _init():
            inprob_ref[...] = jnp.zeros_like(inprob_ref)

        def step(i, in_prob):
            # ---- detection: first-occurrence argmin over states (%2), pure VPU
            rows = [in_prob[s:s + 1, :] for s in range(S)]               # each [1, B]
            items = [(rows[s], jnp.full_like(rows[s], float(s & 1))) for s in range(S)]
            while len(items) > 1:
                nxt = []
                for k in range(0, len(items) - 1, 2):
                    va, ba = items[k]
                    vb, bb = items[k + 1]
                    take_a = va <= vb          # ties -> lower index (first occurrence)
                    nxt.append((jnp.where(take_a, va, vb),
                                jnp.where(take_a, ba, bb)))
                if len(items) % 2 == 1:
                    nxt.append(items[-1])
                items = nxt
            _, bit = items[0]                                            # [1, B]
            det_ref[pl.ds(i, 1), :] = bit

            # ---- ACS: metric = in_prob - priors[i]; pair-min per the trellis
            metric = in_prob - p_ref[i]                                  # [S, B]
            mrows = [metric[s:s + 1, :] for s in range(S)]
            pair_cache = {}
            new_rows = []
            for s in range(S):
                key = (int(tt[s, 0]), int(tt[s, 1]))
                if key not in pair_cache:
                    pair_cache[key] = jnp.minimum(mrows[key[0]], mrows[key[1]])
                new_rows.append(pair_cache[key])
            return jnp.concatenate(new_rows, axis=0)                     # [S, B]

        final = lax.fori_loop(0, tile_t, step, inprob_ref[...], unroll=unroll)
        inprob_ref[...] = final

    return viterbi_kernel


def viterbi_detect(priors_tm, tt, *, tile_t=512, unroll=8):
    """priors_tm: [T, S, B] (time-major, states on sublanes) -> detected [B, T]."""
    T, S, B = priors_tm.shape
    tile_t = int(min(tile_t, _round_up(T, 8)))
    unroll = int(min(unroll, tile_t))
    Tp = _round_up(T, tile_t)
    if Tp != T:
        # zero-padded trailing steps never affect detections for t < T
        priors_tm = jnp.pad(priors_tm, ((0, Tp - T), (0, 0), (0, 0)))

    det_tm = pl.pallas_call(
        make_viterbi_kernel(np.asarray(tt), tile_t, unroll),
        out_shape=jax.ShapeDtypeStruct((Tp, B), jnp.float32),
        grid=(Tp // tile_t,),
        in_specs=[pl.BlockSpec((tile_t, S, B), lambda t: (t, 0, 0))],
        out_specs=pl.BlockSpec((tile_t, B), lambda t: (t, 0)),
        scratch_shapes=[pltpu.VMEM((S, B), jnp.float32)],
        compiler_params=pltpu.CompilerParams(dimension_semantics=("arbitrary",)),
    )(priors_tm)

    return det_tm[:T].T                                                 # [B, T]


# ----------------------------------------------------------------------------
# Full forward (mirrors VNETDetector.forward).
# ----------------------------------------------------------------------------
def vnet_detector_forward(y, params, tt, phase: str):
    B, T = y.shape
    out = mlp_priors_flat(y, params)                   # [S, B*T], n = b*T + t
    S = out.shape[0]
    if phase == "val":
        priors_tm = out.reshape(S, B, T).transpose(2, 0, 1)   # [T, S, B]
        return viterbi_detect(priors_tm, tt)                  # [B, T]
    return out.reshape(S, B, T).transpose(1, 2, 0)            # [B, T, S]


# ----------------------------------------------------------------------------
# Pure numpy references (for self-check only).
# ----------------------------------------------------------------------------
def ref_priors(y, params):
    w1, b1, w2, b2 = (np.asarray(p, np.float32) for p in params)
    y = np.asarray(y, np.float32)
    h = np.maximum(y.reshape(-1, 1) @ w1 + b1, 0.0)
    p = h @ w2 + b2
    return p.reshape(y.shape[0], y.shape[1], -1)


def ref_viterbi(priors, tt):
    priors = np.asarray(priors, np.float32)
    B, T, S = priors.shape
    in_prob = np.zeros((B, S), np.float32)
    det = np.zeros((B, T), np.float32)
    for i in range(T):
        det[:, i] = np.argmin(in_prob, axis=1) % 2
        metric = in_prob - priors[:, i]
        in_prob = metric[:, tt].min(axis=2)
    return det


if __name__ == "__main__":
    N_STATES = 4
    B, T = 2, 1500            # exercises multi-tile MLP + multi-tile Viterbi + padding
    H = HIDDEN1_SIZE

    key = jax.random.PRNGKey(0)
    ky, k1, k2, k3, k4 = jax.random.split(key, 5)

    # input: [batch_size, transmission_length]
    y = jax.random.normal(ky, (B, T), dtype=jnp.float32)

    # Deterministic parameters (PyTorch Linear shapes: W1 [75,1], b1 [75],
    # W2 [n_states,75], b2 [n_states]; stored pre-transposed for x @ W.T).
    bound1 = 1.0                     # 1/sqrt(fan_in=1)
    bound2 = 1.0 / np.sqrt(H)        # 1/sqrt(fan_in=75)
    w1 = jax.random.uniform(k1, (1, H), jnp.float32, -bound1, bound1)
    b1 = jax.random.uniform(k2, (1, H), jnp.float32, -bound1, bound1)
    w2 = jax.random.uniform(k3, (H, N_STATES), jnp.float32, -bound2, bound2)
    b2 = jax.random.uniform(k4, (1, N_STATES), jnp.float32, -bound2, bound2)
    params = (w1, b1, w2, b2)

    tt = create_transition_table(N_STATES)

    # phase == 'train': estimated priors [B, T, n_states]
    priors = vnet_detector_forward(y, params, tt, "train")
    # phase == 'val': detected word [B, T]
    detected = vnet_detector_forward(y, params, tt, "val")
    jax.block_until_ready((priors, detected))

    # self-check against numpy references
    assert priors.shape == (B, T, N_STATES)
    assert detected.shape == (B, T)
    p_ref = ref_priors(y, params)
    assert np.allclose(np.asarray(priors), p_ref, atol=2e-2, rtol=2e-2), "priors mismatch"
    d_ref = ref_viterbi(np.asarray(priors), tt)  # reference Viterbi driven by kernel priors
    assert np.array_equal(np.asarray(detected), d_ref), "detected word mismatch"

    print("KERNEL_OK")
</pallas_src>

<mosaic_0001>
module attributes {stable_mosaic.version = 11 : i64} {
  func.func @mlp_kernel(%arg0: i32, %arg1: memref<1x2048xf32, #tpu.memory_space<vmem>>, %arg2: memref<128x1xf32, #tpu.memory_space<vmem>>, %arg3: memref<128x1xf32, #tpu.memory_space<vmem>>, %arg4: memref<4x128xf32, #tpu.memory_space<vmem>>, %arg5: memref<4x1xf32, #tpu.memory_space<vmem>>, %arg6: memref<4x2048xf32, #tpu.memory_space<vmem>>) attributes {dimension_semantics = [#tpu.dimension_semantics<parallel>], iteration_bounds = array<i64: 2>, scalar_prefetch = 0 : i64, scratch_operands = 0 : i64, tpu.core_type = #tpu.core_type<tc>, window_params = [{transform_indices = @transform_0, window_bounds = array<i64: 1, 2048>}, {pipeline_mode = #tpu.pipeline_mode<synchronous>, transform_indices = @transform_1, window_bounds = array<i64: 128, 1>}, {pipeline_mode = #tpu.pipeline_mode<synchronous>, transform_indices = @transform_2, window_bounds = array<i64: 128, 1>}, {pipeline_mode = #tpu.pipeline_mode<synchronous>, transform_indices = @transform_3, window_bounds = array<i64: 4, 128>}, {pipeline_mode = #tpu.pipeline_mode<synchronous>, transform_indices = @transform_4, window_bounds = array<i64: 4, 1>}, {transform_indices = @transform_5, window_bounds = array<i64: 4, 2048>}]} {
    %c0 = arith.constant 0 : index
    %c0_0 = arith.constant 0 : index
    %0 = vector.load %arg1[%c0, %c0_0] : memref<1x2048xf32, #tpu.memory_space<vmem>>, vector<1x2048xf32>
    %c0_1 = arith.constant 0 : index
    %c0_2 = arith.constant 0 : index
    %1 = vector.load %arg2[%c0_1, %c0_2] : memref<128x1xf32, #tpu.memory_space<vmem>>, vector<128x1xf32>
    %2 = vector.broadcast %1 : vector<128x1xf32> to vector<128x2048xf32>
    %3 = vector.broadcast %0 : vector<1x2048xf32> to vector<128x2048xf32>
    %4 = arith.mulf %2, %3 : vector<128x2048xf32>
    %c0_3 = arith.constant 0 : index
    %c0_4 = arith.constant 0 : index
    %5 = vector.load %arg3[%c0_3, %c0_4] : memref<128x1xf32, #tpu.memory_space<vmem>>, vector<128x1xf32>
    %6 = vector.broadcast %5 : vector<128x1xf32> to vector<128x2048xf32>
    %7 = arith.addf %4, %6 : vector<128x2048xf32>
    %cst = arith.constant 0.000000e+00 : f32
    %8 = vector.broadcast %cst : f32 to vector<128x2048xf32>
    %9 = arith.maximumf %7, %8 : vector<128x2048xf32>
    %c0_5 = arith.constant 0 : index
    %c0_6 = arith.constant 0 : index
    %10 = vector.load %arg4[%c0_5, %c0_6] : memref<4x128xf32, #tpu.memory_space<vmem>>, vector<4x128xf32>
    %cst_7 = arith.constant dense<0.000000e+00> : vector<4x2048xf32>
    %11 = tpu.matmul %10, %9, %cst_7 {dimension_numbers = #tpu.dot_dimension_numbers<[1], [0], [0], [1], [0, 0, 1, 1], [], []>} : vector<4x128xf32>, vector<128x2048xf32>, vector<4x2048xf32> -> vector<4x2048xf32>
    %c0_8 = arith.constant 0 : index
    %c0_9 = arith.constant 0 : index
    %12 = vector.load %arg5[%c0_8, %c0_9] : memref<4x1xf32, #tpu.memory_space<vmem>>, vector<4x1xf32>
    %13 = vector.broadcast %12 : vector<4x1xf32> to vector<4x2048xf32>
    %14 = arith.addf %11, %13 : vector<4x2048xf32>
    %c0_10 = arith.constant 0 : index
    %c0_11 = arith.constant 0 : index
    %15 = vector.load %arg6[%c0_10, %c0_11] : memref<4x2048xf32, #tpu.memory_space<vmem>>, vector<4x2048xf32>
    tpu.vector_store %arg6[%c0_10, %c0_11], %14 {strides = array<i32>} : memref<4x2048xf32, #tpu.memory_space<vmem>>, vector<4x2048xf32>,
    return
  }
  func.func @transform_0(%arg0: i32) -> (i32, i32) {
    %c0_i32 = arith.constant 0 : i32
    %c0_i32_0 = arith.constant 0 : i32
    return %c0_i32, %arg0 : i32, i32
  }
  func.func @transform_1(%arg0: i32) -> (i32, i32) {
    %c0_i32 = arith.constant 0 : i32
    %c0_i32_0 = arith.constant 0 : i32
    %c0_i32_1 = arith.constant 0 : i32
    return %c0_i32, %c0_i32_0 : i32, i32
  }
  func.func @transform_2(%arg0: i32) -> (i32, i32) {
    %c0_i32 = arith.constant 0 : i32
    %c0_i32_0 = arith.constant 0 : i32
    %c0_i32_1 = arith.constant 0 : i32
    return %c0_i32, %c0_i32_0 : i32, i32
  }
  func.func @transform_3(%arg0: i32) -> (i32, i32) {
    %c0_i32 = arith.constant 0 : i32
    %c0_i32_0 = arith.constant 0 : i32
    %c0_i32_1 = arith.constant 0 : i32
    return %c0_i32, %c0_i32_0 : i32, i32
  }
  func.func @transform_4(%arg0: i32) -> (i32, i32) {
    %c0_i32 = arith.constant 0 : i32
    %c0_i32_0 = arith.constant 0 : i32
    %c0_i32_1 = arith.constant 0 : i32
    return %c0_i32, %c0_i32_0 : i32, i32
  }
  func.func @transform_5(%arg0: i32) -> (i32, i32) {
    %c0_i32 = arith.constant 0 : i32
    %c0_i32_0 = arith.constant 0 : i32
    return %c0_i32, %arg0 : i32, i32
  }
}

</mosaic_0001>

<bundles_post_ra>
// kernel: tpu_custom_call.1
= control target key start
LH: loop header
LB: loop body
LE: loop exit
PB: predicated region body
PF: predicated region fallthrough
CT: control target
= control target key end

     0   :  { %10 = vsyncpa [#allocation3], 0  ;;  %s3541_s0 = inlined_call_operand.vmem [shape: f32[1,4096], index: 0, kind: input, shape index: {}]   ;;  %s3542_s1 = inlined_call_operand.vmem [shape: f32[128,1], index: 1, kind: input, shape index: {}]   ;;  %s3543_s2 = inlined_call_operand.vmem [shape: f32[128,1], index: 2, kind: input, shape index: {}]   ;;  %s3544_s3 = inlined_call_operand.vmem [shape: f32[4,128], index: 3, kind: input, shape index: {}]   ;;  %s3545_s4 = inlined_call_operand.vmem [shape: f32[4,1], index: 4, kind: input, shape index: {}]   ;;  %s3546_s5 = inlined_call_operand.hbm [shape: f32[4,4096], index: 5, kind: output, shape index: {}]  }
   0x1   :  { %12 = vsyncpa [#allocation3 + $0x1], 0  ;;  %s2363_s18 = smov 0   ;;  %s2365_s19 = smov 0  }
   0x2   :  { %s2367_s20 = smov 0   ;;  %s2369_s21 = smov 0  }
   0x3 LB: > { %s2384_s22 = sadd.s32 4294967295, %s2328_s21   ;;  %s1953_s23 = sadd.s32 4294967294, %s2328_s21   ;;  %s2328_s21 = sphi %s2369_s21, %s3596_s21   ;;  %s2324_s20 = sphi %s2367_s20, %s3595_s20   ;;  %s2320_s19 = sphi %s2365_s19, %s3594_s19   ;;  %s2316_s18 = sphi %s2363_s18, %s3593_s18  }
   0x4   : > { %s2388_s24 = sadd.s32 1, %s2328_s21   ;;  %s135_s25 = sadd.s32 1, %s2324_s20 }
   0x5   : > { %s132_s26 = ssub.s32 %s2328_s21, %s2388_s24  ;;  %p145_p0 = scmp.ne.s32.totalorder %s2324_s20, %s2320_s19 }
   0x6   : > { %p133_p1 = scmp.eq.s32.totalorder %s132_s26, 0  ;;  %p146_p2 = scmp.eq.s32.totalorder %s2384_s22, 1 }
   0x7   : > { %p151_p3 = scmp.ne.s32.totalorder %s2320_s19, %s2316_s18  ;;  %p152_p4 = scmp.eq.s32.totalorder %s1953_s23, 1 }
   0x8   : > { %s2399_s27 = scalar_select %p133_p1, %s2324_s20, %s135_s25  }
   0x9   : > { %p2401_p5 = por %p146_p2, %p145_p0  ;;  %p2405_p6 = por %p152_p4, %p151_p3 }
   0xa   : > { %p1956_p7 = scmp.ge.s32.totalorder %s2328_s21, 1  ;;  %p190_p8 = scmp.lt.s32.totalorder %s2328_s21, 3 }
   0xc   : > { %p191_p9 = pnand %p1956_p7, %p190_p8 }
   0xe   : > { %194 = sbr.rel (%p191_p9) target bundleno = 617 (0x269), region = 40 }
  0x15   : > { %v659_v0 = vld [vmem:[%s3543_s2] sm:$0xff]  ;;  %s1958_s9 = sshll.u32 %s2384_s22, 4  ;;  %v323_v2 = vlaneseq  ;;  %v2330_v3 = vmov 0   ;;  %v660_v4 = vld [vmem:[%s3543_s2 + $0x8] sm:$0xff]  ;;  %v228_v7 = vld [vmem:[%s3542_s1 + $0x18] sm:$0xff]  ;;  %v3550_v43 = vmov 0.0  }
  0x16   : > { %v225_v1 = vld [vmem:[%s3542_s1] sm:$0xff]  ;;  %2263 = vset.pattern.permute.xlu1 %v2330_v3  ;;  %2262 = vset.pattern.permute.xlu0 %v2330_v3  ;;  %p218_p10 = scmp.lt.s32.totalorder %s1958_s9, 31  ;;  %v226_v5 = vld [vmem:[%s3542_s1 + $0x8] sm:$0xff]  ;;  %v227_v8 = vld [vmem:[%s3542_s1 + $0x10] sm:$0xff]  ;;  %s214_s17 = sand.u32 1, %s2320_s19  }
  0x17   : > { %677 = vperm.xlu1 %2263, %v659_v0   ;;  %243 = vperm.xlu0 %2262, %v225_v1   ;;  %v2424_v6 = vshrl.u32 %v323_v2, 7  ;;  %v662_v11 = vld [vmem:[%s3543_s2 + $0x18] sm:$0xff]  ;;  %v661_v12 = vld [vmem:[%s3543_s2 + $0x10] sm:$0xff]  ;;  %v230_v16 = vld [vmem:[%s3542_s1 + $0x28] sm:$0xff]  ;;  %s1957_s23 = sshll.u32 %s214_s17, 6  ;;  %s1964_s30 = sshll.u32 %s2384_s22, 10 }
  0x18   : > { %s3598_s9 = smov (!%p218_p10, %s1958_s9), 31  ;;  %v229_v17 = vld [vmem:[%s3542_s1 + $0x20] sm:$0xff]  ;;  %v664_v18 = vld [vmem:[%s3543_s2 + $0x28] sm:$0xff]  ;;  %v232_v20 = vld [vmem:[%s3542_s1 + $0x38] sm:$0xff]  ;;  %1338 = vmatprep.mubr.f32.mxu0 %v3550_v43  ;;  %1409 = vmatprep.mubr.f32.mxu1 %v3550_v43  ;;  %s3482_s25 = scalar_lea.vmem [#allocation2], %s1957_s23 }
  0x19   : > { %3569 = vst [vmem:[#allocation5_spill] sm:$0xff] %v2424_v6  ;;  %s2435_s26 = scalar_lea.vmem %s3541_s0, %s3598_s9  ;;  %v325_v9 = vsub.s32 0, %v2424_v6  ;;  %v333_v10 = vsub.s32 2, %v2424_v6  ;;  %v663_v19 = vld [vmem:[%s3543_s2 + $0x20] sm:$0xff]  ;;  %v231_v21 = vld [vmem:[%s3542_s1 + $0x30] sm:$0xff]  ;;  %v666_v22 = vld [vmem:[%s3543_s2 + $0x38] sm:$0xff]  ;;  %s3495_s9 = scalar_lea.hbm %s3546_s5, %s1964_s30 }
  0x1a   : > { %v2446_v13 = vld [vmem:[%s2435_s26 + $0x8] sm:$0xff]  ;;  %v665_v23 = vld [vmem:[%s3543_s2 + $0x30] sm:$0xff]  ;;  %v233_v25 = vld [vmem:[%s3542_s1 + $0x40] sm:$0xff]  ;;  %v329_v38 = vsub.s32 1, %v2424_v6  ;;  %v337_v44 = vsub.s32 3, %v2424_v6  ;;  %v345_v46 = vsub.s32 5, %v2424_v6 }
  0x1b   : > { %682 = vperm.xlu1 %2263, %v660_v4   ;;  %248 = vperm.xlu0 %2262, %v226_v5   ;;  %v2451_v14 = vrot.slane %v2446_v13, %v325_v9  ;;  %v2456_v15 = vrot.slane %v2446_v13, %v333_v10  ;;  %v234_v24 = vld [vmem:[%s3542_s1 + $0x48] sm:$0xff]  ;;  %v667_v27 = vld [vmem:[%s3543_s2 + $0x40] sm:$0xff]  ;;  %v236_v28 = vld [vmem:[%s3542_s1 + $0x58] sm:$0xff]  ;;  %v3549_v47 = vsub.s32 7, %v2424_v6  ;;  %v3548_v48 = vsub.s32 4, %v2424_v6  ;;  %s1897_s6 = sshll.u32 %s3482_s25, 4  ;;  %s3497_s6 = int_to_ptr.vmem [resolvable:$true] %s1897_s6 }
  0x1c   : > { %v668_v26 = vld [vmem:[%s3543_s2 + $0x48] sm:$0xff]  ;;  %v235_v29 = vld [vmem:[%s3542_s1 + $0x50] sm:$0xff]  ;;  %v670_v30 = vld [vmem:[%s3543_s2 + $0x58] sm:$0xff]  ;;  %v2532_v41 = vrot.slane %v2446_v13, %v329_v38  ;;  %v3547_v49 = vsub.s32 6, %v2424_v6  ;;  %s1883_s10 = scalar_lea.sflag [#allocation3], %s214_s17  ;;  %s2266_s11 = scalar_lea.vmem %s3497_s6, 1024 }
  0x1d   : > { %3570 = vst [vmem:[#allocation6_spill] sm:$0xff] %v2451_v14  ;;  %3571 = vst [vmem:[#allocation7_spill] sm:$0xff] %v2456_v15  ;;  %v669_v31 = vld [vmem:[%s3543_s2 + $0x50] sm:$0xff]  ;;  %v238_v32 = vld [vmem:[%s3542_s1 + $0x68] sm:$0xff]  ;;  %p2267_p11 = scmp.ne.s32.totalorder %s3497_s6, %s2266_s11  ;;  %s2332_s22 = smov [#allocation2]  }
  0x1e   : > { %v237_v33 = vld [vmem:[%s3542_s1 + $0x60] sm:$0xff]  ;;  %v672_v34 = vld [vmem:[%s3543_s2 + $0x68] sm:$0xff]  ;;  %v240_v36 = vld [vmem:[%s3542_s1 + $0x78] sm:$0xff]  ;;  %3572 = vst [vmem:[#allocation8_spill] sm:$0xff] %v2532_v41  ;;  %s2270_s12 = sshll.u32 %s2332_s22, 4  ;;  %s2271_s12 = int_to_ptr.vmem [resolvable:$false] %s2270_s12 }
  0x1f   : > { %258 = vperm.xlu1 %2263, %v228_v7   ;;  %253 = vperm.xlu0 %2262, %v227_v8   ;;  %v671_v35 = vld [vmem:[%s3543_s2 + $0x60] sm:$0xff]  ;;  %v239_v37 = vld [vmem:[%s3542_s1 + $0x70] sm:$0xff]  ;;  %v674_v39 = vld [vmem:[%s3543_s2 + $0x78] sm:$0xff]  ;;  %p2268_p12 = pnand %p2267_p11, %p2401_p5  ;;  %s2272_s13 = scalar_lea.vmem %s2271_s12, 2048 }
  0x20   : > { %v673_v40 = vld [vmem:[%s3543_s2 + $0x70] sm:$0xff]  ;;  %v1268_v42 = vld [vmem:[%s3545_s4] sm:$0xf]  ;;  %p2273_p0 = scmp.lt.s32.totalorder %s3497_s6, %s2271_s12  ;;  %p2274_p1 = scmp.lt.s32.totalorder %s2272_s13, %s2266_s11 }
  0x21   : > { %v223_v45 = vld [vmem:[%s2435_s26] sm:$0xff]  ;;  %p2269_p13 = pneg %p2268_p12 }
  0x22   : > { %v2545_v50 = vrot.slane %v223_v45, %v329_v38  ;;  %v2547_v51 = vrot.slane %v223_v45, %v337_v44  ;;  %v2551_v52 = vrot.slane %v223_v45, %v325_v9  ;;  %v2555_v53 = vrot.slane %v223_v45, %v333_v10  ;;  %p2275_p2 = por %p2274_p1, %p2273_p0 }
  0x23   : > { %692 = vperm.xlu1 %2263, %v662_v11   ;;  %687 = vperm.xlu0 %2262, %v661_v12   ;;  %v2557_v54 = vrot.slane %v223_v45, %v345_v46  ;;  %v2561_v55 = vrot.slane %v223_v45, %v3549_v47  ;;  %v2565_v56 = vrot.slane %v223_v45, %v3548_v48 }
  0x24   : > { %v2569_v57 = vrot.slane %v223_v45, %v3547_v49  ;;  %p2276_p3 = pnand %p2275_p2, %p2269_p13 }
  0x27   : > { %268 = vperm.xlu1 %2263, %v230_v16   ;;  %263 = vperm.xlu0 %2262, %v229_v17   ;;  %v2606_v16 = vrot.slane %v2446_v13, %v337_v44  ;;  %v2609_v17 = vrot.slane %v2446_v13, %v345_v46 }
  0x29   : > { %3577 = vst [vmem:[#allocation13_spill] sm:$0xff] %v2606_v16  ;;  %3578 = vst [vmem:[#allocation14_spill] sm:$0xff] %v2609_v17 }
  0x2b   : > { %702 = vperm.xlu1 %2263, %v664_v18   ;;  %697 = vperm.xlu0 %2262, %v663_v19  }
  0x2f   : > { %278 = vperm.xlu1 %2263, %v232_v20   ;;  %273 = vperm.xlu0 %2262, %v231_v21  }
  0x33   : > { %712 = vperm.xlu1 %2263, %v666_v22   ;;  %707 = vperm.xlu0 %2262, %v665_v23  }
  0x37   : > { %288 = vperm.xlu1 %2263, %v234_v24   ;;  %283 = vperm.xlu0 %2262, %v233_v25  }
  0x3b   : > { %722 = vperm.xlu1 %2263, %v668_v26   ;;  %717 = vperm.xlu0 %2262, %v667_v27  }
  0x3f   : > { %298 = vperm.xlu1 %2263, %v236_v28   ;;  %293 = vperm.xlu0 %2262, %v235_v29  }
  0x43   : > { %732 = vperm.xlu1 %2263, %v670_v30   ;;  %727 = vperm.xlu0 %2262, %v669_v31  }
  0x47   : > { %308 = vperm.xlu1 %2263, %v238_v32   ;;  %303 = vperm.xlu0 %2262, %v237_v33  }
  0x4b   : > { %742 = vperm.xlu1 %2263, %v672_v34   ;;  %737 = vperm.xlu0 %2262, %v671_v35  }
  0x4f   : > { %318 = vperm.xlu1 %2263, %v240_v36   ;;  %313 = vperm.xlu0 %2262, %v239_v37  }
  0x53   : > { %752 = vperm.xlu1 %2263, %v674_v39   ;;  %747 = vperm.xlu0 %2262, %v673_v40  }
  0x57   : > { %1271 = vperm.xlu0 %2262, %v1268_v42  }
  0x96   : > { %v2571_v58 = vpop.permute.xlu1 %677  ;;  %v2573_v59 = vpop.permute.xlu0 %243 }
  0x97   : > { %3573 = vst [vmem:[#allocation9_spill] sm:$0xff] %v2571_v58  ;;  %3574 = vst [vmem:[#allocation10_spill] sm:$0xff] %v2573_v59  ;;  %v404_v60 = vmul.f32 %v2545_v50, %v2573_v59  ;;  %v406_v61 = vmul.f32 %v2547_v51, %v2573_v59  ;;  %v403_v62 = vmul.f32 %v2551_v52, %v2573_v59 }
  0x98   : > { %v405_v63 = vmul.f32 %v2555_v53, %v2573_v59  ;;  %v408_v0 = vmul.f32 %v2557_v54, %v2573_v59  ;;  %v410_v1 = vmul.f32 %v2561_v55, %v2573_v59  ;;  %v407_v2 = vmul.f32 %v2565_v56, %v2573_v59 }
  0x99   : > { %v409_v3 = vmul.f32 %v2569_v57, %v2573_v59  ;;  %v756_v4 = vadd.f32 %v2571_v58, %v404_v60  ;;  %v758_v5 = vadd.f32 %v2571_v58, %v406_v61  ;;  %v755_v7 = vadd.f32 %v2571_v58, %v403_v62 }
  0x9a   : > { %v757_v8 = vadd.f32 %v2571_v58, %v405_v63  ;;  %v2595_v9 = vpop.permute.xlu1 %682  ;;  %v2597_v10 = vpop.permute.xlu0 %248  ;;  %v2600_v11 = vadd.f32 %v2571_v58, %v408_v0  ;;  %v2603_v12 = vadd.f32 %v2571_v58, %v410_v1  ;;  %v2616_v20 = vadd.f32 %v2571_v58, %v407_v2 }
  0x9b   : > { %3575 = vst [vmem:[#allocation11_spill] sm:$0xff] %v2595_v9  ;;  %3576 = vst [vmem:[#allocation12_spill] sm:$0xff] %v2597_v10  ;;  %v420_v18 = vmul.f32 %v2545_v50, %v2597_v10  ;;  %v422_v19 = vmul.f32 %v2547_v51, %v2597_v10  ;;  %v2619_v21 = vadd.f32 %v2571_v58, %v409_v3  ;;  %v1012_v22 = vmax.f32 %v756_v4, 0.0 }
  0x9c   : > { %v1014_v23 = vmax.f32 %v758_v5, 0.0  ;;  %v419_v24 = vmul.f32 %v2551_v52, %v2597_v10  ;;  %v421_v13 = vmul.f32 %v2555_v53, %v2597_v10  ;;  %v1011_v27 = vmax.f32 %v755_v7, 0.0 }
  0x9d   : > { %v772_v25 = vadd.f32 %v2595_v9, %v420_v18  ;;  %v774_v26 = vadd.f32 %v2595_v9, %v422_v19  ;;  %v1013_v28 = vmax.f32 %v757_v8, 0.0  ;;  %v424_v33 = vmul.f32 %v2557_v54, %v2597_v10 }
  0x9e   : > { %v2627_v29 = vpop.permute.xlu1 %258  ;;  %v2629_v30 = vpop.permute.xlu0 %253  ;;  %v771_v31 = vadd.f32 %v2595_v9, %v419_v24  ;;  %v773_v32 = vadd.f32 %v2595_v9, %v421_v13  ;;  %v2637_v34 = vmul.f32 %v2561_v55, %v2597_v10 }
  0x9f   : > { %v1028_v35 = vmax.f32 %v772_v25, 0.0  ;;  %v1030_v36 = vmax.f32 %v774_v26, 0.0  ;;  %v436_v37 = vmul.f32 %v2545_v50, %v2629_v30  ;;  %v452_v38 = vmul.f32 %v2545_v50, %v2627_v29 }
  0xa0   : > { %v1027_v39 = vmax.f32 %v771_v31, 0.0  ;;  %v1029_v40 = vmax.f32 %v773_v32, 0.0  ;;  %v438_v42 = vmul.f32 %v2547_v51, %v2629_v30  ;;  %v454_v44 = vmul.f32 %v2547_v51, %v2627_v29 }
  0xa1   : > { %v1965_v45 = vpack.c.bf16 %v1028_v35, %v1012_v22  ;;  %v1997_v46 = vpack.c.bf16 %v1030_v36, %v1014_v23  ;;  %v435_v60 = vmul.f32 %v2551_v52, %v2629_v30  ;;  %v451_v61 = vmul.f32 %v2551_v52, %v2627_v29 }
  0xa2   : > { %v2651_v62 = vpop.permute.xlu1 %692  ;;  %v2653_v63 = vpop.permute.xlu0 %687  ;;  %v1967_v0 = vpack.c.bf16 %v1027_v39, %v1011_v27  ;;  %v1999_v1 = vpack.c.bf16 %v1029_v40, %v1013_v28  ;;  %v437_v2 = vmul.f32 %v2555_v53, %v2629_v30  ;;  %v453_v3 = vmul.f32 %v2555_v53, %v2627_v29 }
  0xa3   : > { %1966 = vmatprep.subr.bf16.mxu0 %v1965_v45  ;;  %1998 = vmatprep.subr.bf16.mxu1 %v1997_v46  ;;  %v788_v4 = vadd.f32 %v2653_v63, %v436_v37  ;;  %v804_v5 = vadd.f32 %v2651_v62, %v452_v38  ;;  %v790_v7 = vadd.f32 %v2653_v63, %v438_v42 }
  0xa4   : > { %1968 = vmatpush1.bf16.msra.mxu0 %v1967_v0  ;;  %2000 = vmatpush1.bf16.msra.mxu1 %v1999_v1  ;;  %v806_v8 = vadd.f32 %v2651_v62, %v454_v44  ;;  %v787_v18 = vadd.f32 %v2653_v63, %v435_v60  ;;  %v803_v19 = vadd.f32 %v2651_v62, %v451_v61 }
  0xa5   : > { %v1044_v22 = vmax.f32 %v788_v4, 0.0  ;;  %v1060_v23 = vmax.f32 %v804_v5, 0.0  ;;  %v1046_v24 = vmax.f32 %v790_v7, 0.0  ;;  %v789_v13 = vadd.f32 %v2653_v63, %v437_v2 }
  0xa6   : > { %v2666_v25 = vpop.permute.xlu1 %268  ;;  %v2668_v26 = vpop.permute.xlu0 %263  ;;  %v1062_v27 = vmax.f32 %v806_v8, 0.0  ;;  %v1043_v28 = vmax.f32 %v787_v18, 0.0  ;;  %v1059_v31 = vmax.f32 %v803_v19, 0.0  ;;  %v805_v32 = vadd.f32 %v2651_v62, %v453_v3 }
  0xa7   : > { %v1969_v35 = vpack.c.bf16 %v1060_v23, %v1044_v22  ;;  %v1045_v36 = vmax.f32 %v789_v13, 0.0  ;;  %v468_v37 = vmul.f32 %v2545_v50, %v2668_v26  ;;  %v484_v38 = vmul.f32 %v2545_v50, %v2666_v25 }
  0xa8   : > { %v2001_v39 = vpack.c.bf16 %v1062_v27, %v1046_v24  ;;  %v1971_v40 = vpack.c.bf16 %v1059_v31, %v1043_v28  ;;  %v1061_v42 = vmax.f32 %v805_v32, 0.0  ;;  %v470_v44 = vmul.f32 %v2547_v51, %v2668_v26 }
  0xa9   : > { %1970 = vmatprep.subr.bf16.mxu0 %v1969_v35  ;;  %v486_v45 = vmul.f32 %v2547_v51, %v2666_v25  ;;  %v467_v46 = vmul.f32 %v2551_v52, %v2668_v26  ;;  %v483_v60 = vmul.f32 %v2551_v52, %v2666_v25  ;;  %v469_v61 = vmul.f32 %v2555_v53, %v2668_v26 }
  0xaa   : > { %2002 = vmatprep.subr.bf16.mxu1 %v2001_v39  ;;  %v2685_v0 = vpop.permute.xlu1 %702  ;;  %v2687_v1 = vpop.permute.xlu0 %697  ;;  %1972 = vmatpush1.bf16.msra.mxu0 %v1971_v40  ;;  %v2003_v2 = vpack.c.bf16 %v1061_v42, %v1045_v36  ;;  %v485_v3 = vmul.f32 %v2555_v53, %v2666_v25  ;;  %v2692_v4 = vadd.f32 %v2595_v9, %v424_v33 }
  0xab   : > { %v820_v5 = vadd.f32 %v2687_v1, %v468_v37  ;;  %v836_v7 = vadd.f32 %v2685_v0, %v484_v38  ;;  %v822_v8 = vadd.f32 %v2687_v1, %v470_v44  ;;  %v838_v18 = vadd.f32 %v2685_v0, %v486_v45 }
  0xac   : > { %2004 = vmatpush1.bf16.msra.mxu1 %v2003_v2  ;;  %v819_v19 = vadd.f32 %v2687_v1, %v467_v46  ;;  %v835_v22 = vadd.f32 %v2685_v0, %v483_v60  ;;  %v821_v23 = vadd.f32 %v2687_v1, %v469_v61  ;;  %v837_v24 = vadd.f32 %v2685_v0, %v485_v3 }
  0xad   : > { %v1076_v13 = vmax.f32 %v820_v5, 0.0  ;;  %v1092_v33 = vmax.f32 %v836_v7, 0.0  ;;  %v1078_v27 = vmax.f32 %v822_v8, 0.0  ;;  %v1094_v28 = vmax.f32 %v838_v18, 0.0 }
  0xae   : > { %v2702_v31 = vpop.permute.xlu1 %278  ;;  %v2704_v32 = vpop.permute.xlu0 %273  ;;  %v1075_v35 = vmax.f32 %v819_v19, 0.0  ;;  %v1091_v36 = vmax.f32 %v835_v22, 0.0  ;;  %v1077_v37 = vmax.f32 %v821_v23, 0.0  ;;  %v1093_v38 = vmax.f32 %v837_v24, 0.0 }
  0xaf   : > { %v1973_v39 = vpack.c.bf16 %v1092_v33, %v1076_v13  ;;  %v2005_v40 = vpack.c.bf16 %v1094_v28, %v1078_v27  ;;  %v500_v42 = vmul.f32 %v2545_v50, %v2704_v32  ;;  %v516_v44 = vmul.f32 %v2545_v50, %v2702_v31 }
  0xb0   : > { %v1975_v45 = vpack.c.bf16 %v1091_v36, %v1075_v35  ;;  %v2007_v46 = vpack.c.bf16 %v1093_v38, %v1077_v37  ;;  %v502_v60 = vmul.f32 %v2547_v51, %v2704_v32  ;;  %v518_v61 = vmul.f32 %v2547_v51, %v2702_v31 }
  0xb1   : > { %1974 = vmatprep.subr.bf16.mxu0 %v1973_v39  ;;  %2006 = vmatprep.subr.bf16.mxu1 %v2005_v40  ;;  %v499_v2 = vmul.f32 %v2551_v52, %v2704_v32  ;;  %v515_v3 = vmul.f32 %v2551_v52, %v2702_v31  ;;  %v501_v5 = vmul.f32 %v2555_v53, %v2704_v32  ;;  %v1016_v7 = vmax.f32 %v2600_v11, 0.0 }
  0xb2   : > { %v2721_v8 = vpop.permute.xlu1 %712  ;;  %v2723_v18 = vpop.permute.xlu0 %707  ;;  %1976 = vmatpush1.bf16.msra.mxu0 %v1975_v45  ;;  %2008 = vmatpush1.bf16.msra.mxu1 %v2007_v46  ;;  %v517_v19 = vmul.f32 %v2555_v53, %v2702_v31  ;;  %v1032_v22 = vmax.f32 %v2692_v4, 0.0  ;;  %v2730_v23 = vadd.f32 %v2595_v9, %v2637_v34  ;;  %v423_v24 = vmul.f32 %v2565_v56, %v2597_v10 }
  0xb3   : > { %v852_v11 = vadd.f32 %v2723_v18, %v500_v42  ;;  %v868_v13 = vadd.f32 %v2721_v8, %v516_v44  ;;  %v854_v33 = vadd.f32 %v2723_v18, %v502_v60  ;;  %v870_v27 = vadd.f32 %v2721_v8, %v518_v61 }
  0xb4   : > { %v851_v28 = vadd.f32 %v2723_v18, %v499_v2  ;;  %v867_v35 = vadd.f32 %v2721_v8, %v515_v3  ;;  %v853_v4 = vadd.f32 %v2723_v18, %v501_v5  ;;  %v869_v34 = vadd.f32 %v2721_v8, %v517_v19 }
  0xb5   : > { %v1108_v36 = vmax.f32 %v852_v11, 0.0  ;;  %v1124_v37 = vmax.f32 %v868_v13, 0.0  ;;  %v1110_v38 = vmax.f32 %v854_v33, 0.0  ;;  %v1126_v39 = vmax.f32 %v870_v27, 0.0 }
  0xb6   : > { %v2742_v40 = vpop.permute.xlu1 %288  ;;  %v2744_v42 = vpop.permute.xlu0 %283  ;;  %v1107_v44 = vmax.f32 %v851_v28, 0.0  ;;  %v1123_v45 = vmax.f32 %v867_v35, 0.0  ;;  %v1109_v46 = vmax.f32 %v853_v4, 0.0  ;;  %v1125_v60 = vmax.f32 %v869_v34, 0.0 }
  0xb7   : > { %v1977_v61 = vpack.c.bf16 %v1124_v37, %v1108_v36  ;;  %v2009_v2 = vpack.c.bf16 %v1126_v39, %v1110_v38  ;;  %v532_v3 = vmul.f32 %v2545_v50, %v2744_v42  ;;  %v548_v5 = vmul.f32 %v2545_v50, %v2742_v40 }
  0xb8   : > { %v1979_v19 = vpack.c.bf16 %v1123_v45, %v1107_v44  ;;  %v2011_v11 = vpack.c.bf16 %v1125_v60, %v1109_v46  ;;  %v534_v13 = vmul.f32 %v2547_v51, %v2744_v42  ;;  %v550_v33 = vmul.f32 %v2547_v51, %v2742_v40 }
  0xb9   : > { %1978 = vmatprep.subr.bf16.mxu0 %v1977_v61  ;;  %2010 = vmatprep.subr.bf16.mxu1 %v2009_v2  ;;  %v531_v27 = vmul.f32 %v2551_v52, %v2744_v42  ;;  %v547_v28 = vmul.f32 %v2551_v52, %v2742_v40  ;;  %v533_v35 = vmul.f32 %v2555_v53, %v2744_v42  ;;  %v1018_v4 = vmax.f32 %v2603_v12, 0.0 }
  0xba   : > { %v2761_v34 = vpop.permute.xlu1 %722  ;;  %v2763_v36 = vpop.permute.xlu0 %717  ;;  %1980 = vmatpush1.bf16.msra.mxu0 %v1979_v19  ;;  %2012 = vmatpush1.bf16.msra.mxu1 %v2011_v11  ;;  %v549_v37 = vmul.f32 %v2555_v53, %v2742_v40  ;;  %v2767_v38 = vpack.c.bf16 %v1032_v22, %v1016_v7  ;;  %v1034_v39 = vmax.f32 %v2730_v23, 0.0  ;;  %v2771_v44 = vadd.f32 %v2595_v9, %v423_v24 }
  0xbb   : > { %v884_v45 = vadd.f32 %v2763_v36, %v532_v3  ;;  %v900_v12 = vadd.f32 %v2761_v34, %v548_v5  ;;  %v886_v46 = vadd.f32 %v2763_v36, %v534_v13  ;;  %v902_v60 = vadd.f32 %v2761_v34, %v550_v33 }
  0xbc   : > { %v883_v61 = vadd.f32 %v2763_v36, %v531_v27  ;;  %v899_v2 = vadd.f32 %v2761_v34, %v547_v28  ;;  %v885_v7 = vadd.f32 %v2763_v36, %v533_v35  ;;  %v901_v22 = vadd.f32 %v2761_v34, %v549_v37 }
  0xbd   : > { %v1140_v23 = vmax.f32 %v884_v45, 0.0  ;;  %v1156_v19 = vmax.f32 %v900_v12, 0.0  ;;  %v1142_v24 = vmax.f32 %v886_v46, 0.0  ;;  %v1158_v11 = vmax.f32 %v902_v60, 0.0 }
  0xbe   : > { %v2781_v49 = vpop.permute.xlu1 %298  ;;  %v2783_v3 = vpop.permute.xlu0 %293  ;;  %v1139_v5 = vmax.f32 %v883_v61, 0.0  ;;  %v1155_v13 = vmax.f32 %v899_v2, 0.0  ;;  %v1141_v48 = vmax.f32 %v885_v7, 0.0  ;;  %v1157_v33 = vmax.f32 %v901_v22, 0.0 }
  0xbf   : > { %v1981_v47 = vpack.c.bf16 %v1156_v19, %v1140_v23  ;;  %v2013_v27 = vpack.c.bf16 %v1158_v11, %v1142_v24  ;;  %v564_v28 = vmul.f32 %v2545_v50, %v2783_v3  ;;  %v580_v35 = vmul.f32 %v2545_v50, %v2781_v49 }
  0xc0   : > { %v1983_v37 = vpack.c.bf16 %v1155_v13, %v1139_v5  ;;  %v2015_v45 = vpack.c.bf16 %v1157_v33, %v1141_v48  ;;  %v566_v12 = vmul.f32 %v2547_v51, %v2783_v3  ;;  %v582_v46 = vmul.f32 %v2547_v51, %v2781_v49 }
  0xc1   : > { %1982 = vmatprep.subr.bf16.mxu0 %v1981_v47  ;;  %2014 = vmatprep.subr.bf16.mxu1 %v2013_v27  ;;  %v563_v60 = vmul.f32 %v2551_v52, %v2783_v3  ;;  %v579_v61 = vmul.f32 %v2551_v52, %v2781_v49  ;;  %v565_v2 = vmul.f32 %v2555_v53, %v2783_v3  ;;  %v1015_v7 = vmax.f32 %v2616_v20, 0.0 }
  0xc2   : > { %v2800_v48 = vpop.permute.xlu1 %732  ;;  %v2802_v22 = vpop.permute.xlu0 %727  ;;  %1984 = vmatpush1.bf16.msra.mxu0 %v1983_v37  ;;  %2016 = vmatpush1.bf16.msra.mxu1 %v2015_v45  ;;  %v581_v47 = vmul.f32 %v2555_v53, %v2781_v49  ;;  %v2806_v23 = vpack.c.bf16 %v1034_v39, %v1018_v4  ;;  %v1031_v19 = vmax.f32 %v2771_v44, 0.0  ;;  %v425_v24 = vmul.f32 %v2569_v57, %v2597_v10 }
  0xc3   : > { %v916_v11 = vadd.f32 %v2802_v22, %v564_v28  ;;  %v932_v20 = vadd.f32 %v2800_v48, %v580_v35  ;;  %v918_v5 = vadd.f32 %v2802_v22, %v566_v12  ;;  %v934_v13 = vadd.f32 %v2800_v48, %v582_v46 }
  0xc4   : > { %v915_v33 = vadd.f32 %v2802_v22, %v563_v60  ;;  %v931_v27 = vadd.f32 %v2800_v48, %v579_v61  ;;  %v917_v4 = vadd.f32 %v2802_v22, %v565_v2  ;;  %v933_v39 = vadd.f32 %v2800_v48, %v581_v47 }
  0xc5   : > { %v1172_v44 = vmax.f32 %v916_v11, 0.0  ;;  %v1188_v37 = vmax.f32 %v932_v20, 0.0  ;;  %v1174_v45 = vmax.f32 %v918_v5, 0.0  ;;  %v1190_v43 = vmax.f32 %v934_v13, 0.0 }
  0xc6   : > { %v2819_v6 = vpop.permute.xlu1 %308  ;;  %v2821_v28 = vpop.permute.xlu0 %303  ;;  %v1171_v35 = vmax.f32 %v915_v33, 0.0  ;;  %v1187_v12 = vmax.f32 %v931_v27, 0.0  ;;  %v1173_v17 = vmax.f32 %v917_v4, 0.0  ;;  %v1189_v46 = vmax.f32 %v933_v39, 0.0 }
  0xc7   : > { %v1985_v15 = vpack.c.bf16 %v1188_v37, %v1172_v44  ;;  %v2017_v60 = vpack.c.bf16 %v1190_v43, %v1174_v45  ;;  %v596_v61 = vmul.f32 %v2545_v50, %v2821_v28  ;;  %v612_v2 = vmul.f32 %v2545_v50, %v2819_v6 }
  0xc8   : > { %v1987_v47 = vpack.c.bf16 %v1187_v12, %v1171_v35  ;;  %v2019_v11 = vpack.c.bf16 %v1189_v46, %v1173_v17  ;;  %v598_v20 = vmul.f32 %v2547_v51, %v2821_v28  ;;  %v614_v5 = vmul.f32 %v2547_v51, %v2819_v6 }
  0xc9   : > { %1986 = vmatprep.subr.bf16.mxu0 %v1985_v15  ;;  %2018 = vmatprep.subr.bf16.mxu1 %v2017_v60  ;;  %v595_v13 = vmul.f32 %v2551_v52, %v2821_v28  ;;  %v611_v43 = vmul.f32 %v2551_v52, %v2819_v6  ;;  %v597_v33 = vmul.f32 %v2555_v53, %v2821_v28 }
  0xca   : > { %v2837_v27 = vpop.permute.xlu1 %742  ;;  %v2839_v17 = vpop.permute.xlu0 %737  ;;  %1988 = vmatpush1.bf16.msra.mxu0 %v1987_v47  ;;  %2020 = vmatpush1.bf16.msra.mxu1 %v2019_v11  ;;  %v613_v4 = vmul.f32 %v2555_v53, %v2819_v6  ;;  %v2843_v15 = vpack.c.bf16 %v1031_v19, %v1015_v7  ;;  %v777_v39 = vadd.f32 %v2595_v9, %v425_v24 }
  0xcb   : > { %v948_v44 = vadd.f32 %v2839_v17, %v596_v61  ;;  %v964_v37 = vadd.f32 %v2837_v27, %v612_v2  ;;  %v950_v45 = vadd.f32 %v2839_v17, %v598_v20  ;;  %v966_v35 = vadd.f32 %v2837_v27, %v614_v5 }
  0xcc   : > { %v947_v12 = vadd.f32 %v2839_v17, %v595_v13  ;;  %v963_v46 = vadd.f32 %v2837_v27, %v611_v43  ;;  %v949_v60 = vadd.f32 %v2839_v17, %v597_v33  ;;  %v965_v47 = vadd.f32 %v2837_v27, %v613_v4 }
  0xcd   : > { %v1204_v7 = vmax.f32 %v948_v44, 0.0  ;;  %v1220_v19 = vmax.f32 %v964_v37, 0.0  ;;  %v1206_v11 = vmax.f32 %v950_v45, 0.0  ;;  %v1222_v24 = vmax.f32 %v966_v35, 0.0 }
  0xce   : > { %v2854_v14 = vpop.permute.xlu1 %318  ;;  %v2856_v61 = vpop.permute.xlu0 %313  ;;  %v1203_v2 = vmax.f32 %v947_v12, 0.0  ;;  %v1219_v20 = vmax.f32 %v963_v46, 0.0  ;;  %v1205_v9 = vmax.f32 %v949_v60, 0.0  ;;  %v1221_v5 = vmax.f32 %v965_v47, 0.0 }
  0xcf   : > { %v1989_v16 = vpack.c.bf16 %v1220_v19, %v1204_v7  ;;  %v2021_v13 = vpack.c.bf16 %v1222_v24, %v1206_v11  ;;  %v628_v43 = vmul.f32 %v2545_v50, %v2856_v61  ;;  %v644_v33 = vmul.f32 %v2545_v50, %v2854_v14 }
  0xd0   : > { %v1991_v4 = vpack.c.bf16 %v1219_v20, %v1203_v2  ;;  %v2023_v44 = vpack.c.bf16 %v1221_v5, %v1205_v9  ;;  %v630_v37 = vmul.f32 %v2547_v51, %v2856_v61  ;;  %v646_v45 = vmul.f32 %v2547_v51, %v2854_v14 }
  0xd1   : > { %1990 = vmatprep.subr.bf16.mxu0 %v1989_v16  ;;  %2022 = vmatprep.subr.bf16.mxu1 %v2021_v13  ;;  %v627_v35 = vmul.f32 %v2551_v52, %v2856_v61  ;;  %v643_v12 = vmul.f32 %v2551_v52, %v2854_v14  ;;  %v629_v46 = vmul.f32 %v2555_v53, %v2856_v61  ;;  %v1017_v50 = vmax.f32 %v2619_v21, 0.0 }
  0xd2   : > { %v2873_v9 = vpop.permute.xlu1 %752  ;;  %v2875_v60 = vpop.permute.xlu0 %747  ;;  %1992 = vmatpush1.bf16.msra.mxu0 %v1991_v4  ;;  %2024 = vmatpush1.bf16.msra.mxu1 %v2023_v44  ;;  %v645_v51 = vmul.f32 %v2555_v53, %v2854_v14  ;;  %v1033_v16 = vmax.f32 %v777_v39, 0.0  ;;  %v440_v47 = vmul.f32 %v2557_v54, %v2629_v30  ;;  %v456_v52 = vmul.f32 %v2557_v54, %v2627_v29 }
  0xd3   : > { %v980_v7 = vadd.f32 %v2875_v60, %v628_v43  ;;  %v996_v21 = vadd.f32 %v2873_v9, %v644_v33  ;;  %v982_v19 = vadd.f32 %v2875_v60, %v630_v37  ;;  %v998_v11 = vadd.f32 %v2873_v9, %v646_v45 }
  0xd4   : > { %v979_v24 = vadd.f32 %v2875_v60, %v627_v35  ;;  %v995_v2 = vadd.f32 %v2873_v9, %v643_v12  ;;  %v981_v53 = vadd.f32 %v2875_v60, %v629_v46  ;;  %v997_v39 = vadd.f32 %v2873_v9, %v645_v51 }
  0xd5   : > { %v1236_v20 = vmax.f32 %v980_v7, 0.0  ;;  %v1252_v5 = vmax.f32 %v996_v21, 0.0  ;;  %v1238_v13 = vmax.f32 %v982_v19, 0.0  ;;  %v1254_v4 = vmax.f32 %v998_v11, 0.0 }
  0xd6   : > { %v1235_v44 = vmax.f32 %v979_v24, 0.0  ;;  %v1251_v43 = vmax.f32 %v995_v2, 0.0  ;;  %v1237_v58 = vmax.f32 %v981_v53, 0.0  ;;  %v1253_v33 = vmax.f32 %v997_v39, 0.0 }
  0xd7   : > { %v1993_v10 = vpack.c.bf16 %v1252_v5, %v1236_v20  ;;  %v2025_v37 = vpack.c.bf16 %v1254_v4, %v1238_v13  ;;  %v2063_v41 = vpack.c.bf16 %v1033_v16, %v1017_v50  ;;  %v792_v45 = vadd.f32 %v2653_v63, %v440_v47 }
  0xd8   : > { %v1995_v35 = vpack.c.bf16 %v1251_v43, %v1235_v44  ;;  %v2027_v59 = vpack.c.bf16 %v1253_v33, %v1237_v58  ;;  %v808_v12 = vadd.f32 %v2651_v62, %v456_v52  ;;  %v442_v46 = vmul.f32 %v2561_v55, %v2629_v30  ;;  %v2904_v58 = vld [vmem:[%s3544_s3] sm:$0xf] }
  0xd9   : > { %1994 = vmatprep.subr.bf16.mxu0 %v1993_v10  ;;  %2026 = vmatprep.subr.bf16.mxu1 %v2025_v37  ;;  %v1048_v51 = vmax.f32 %v792_v45, 0.0  ;;  %v458_v7 = vmul.f32 %v2561_v55, %v2627_v29  ;;  %v439_v21 = vmul.f32 %v2565_v56, %v2629_v30  ;;  %v455_v50 = vmul.f32 %v2565_v56, %v2627_v29 }
  0xda   : > { %1996 = vmatpush1.bf16.msra.mxu0 %v1995_v35  ;;  %2028 = vmatpush1.bf16.msra.mxu1 %v2027_v59  ;;  %v1064_v16 = vmax.f32 %v808_v12, 0.0  ;;  %v794_v10 = vadd.f32 %v2653_v63, %v442_v46  ;;  %v441_v47 = vmul.f32 %v2569_v57, %v2629_v30  ;;  %v457_v52 = vmul.f32 %v2569_v57, %v2627_v29 }
  0xdb   : > { %2030 = vmatprep.subr.bf16.mxu0 %v2767_v38  ;;  %2062 = vmatprep.subr.bf16.mxu1 %v2806_v23  ;;  %v810_v59 = vadd.f32 %v2651_v62, %v458_v7  ;;  %v791_v19 = vadd.f32 %v2653_v63, %v439_v21  ;;  %v807_v11 = vadd.f32 %v2651_v62, %v455_v50 }
  0xdc   : > { %v2033_v24 = vpack.c.bf16 %v1064_v16, %v1048_v51  ;;  %v1050_v2 = vmax.f32 %v794_v10, 0.0  ;;  %v793_v53 = vadd.f32 %v2653_v63, %v441_v47  ;;  %v809_v39 = vadd.f32 %v2651_v62, %v457_v52 }
  0xdd   : > { %1339 = vmatmul.mubr.f32.vlgmr.msra.gmra.mrb[0].mxu0 %v2904_v58  ;;  %1410 = vmatmul.mubr.f32.vlgmr.msra.gmra.mrb[0].mxu1 %v2904_v58  ;;  %v1066_v20 = vmax.f32 %v810_v59, 0.0  ;;  %v1047_v38 = vmax.f32 %v791_v19, 0.0  ;;  %v1063_v5 = vmax.f32 %v807_v11, 0.0  ;;  %v472_v23 = vmul.f32 %v2557_v54, %v2668_v26 }
  0xde   : > { %2032 = vmatpush1.bf16.msra.mxu0 %v2843_v15  ;;  %2064 = vmatpush1.bf16.msra.mxu1 %v2063_v41  ;;  %v1049_v13 = vmax.f32 %v793_v53, 0.0  ;;  %v1065_v4 = vmax.f32 %v809_v39, 0.0  ;;  %v488_v44 = vmul.f32 %v2557_v54, %v2666_v25  ;;  %v474_v43 = vmul.f32 %v2561_v55, %v2668_v26 }
  0xdf   : > { %2034 = vmatprep.subr.bf16.mxu0 %v2033_v24  ;;  %v2065_v33 = vpack.c.bf16 %v1066_v20, %v1050_v2  ;;  %v2035_v37 = vpack.c.bf16 %v1063_v5, %v1047_v38  ;;  %v824_v45 = vadd.f32 %v2687_v1, %v472_v23  ;;  %v490_v35 = vmul.f32 %v2561_v55, %v2666_v25 }
  0xe0   : > { %v2067_v12 = vpack.c.bf16 %v1065_v4, %v1049_v13  ;;  %v840_v15 = vadd.f32 %v2685_v0, %v488_v44  ;;  %v826_v41 = vadd.f32 %v2687_v1, %v474_v43  ;;  %v471_v46 = vmul.f32 %v2565_v56, %v2668_v26 }
  0xe1   : > { %v3579_v51 = vmov 0.0   ;;  %2066 = vmatprep.subr.bf16.mxu1 %v2065_v33  ;;  %v1080_v7 = vmax.f32 %v824_v45, 0.0  ;;  %v842_v21 = vadd.f32 %v2685_v0, %v490_v35  ;;  %v487_v50 = vmul.f32 %v2565_v56, %v2666_v25 }
  0xe2   : > { %1480 = vmatprep.mubr.f32.mxu0 %v3579_v51  ;;  %v473_v16 = vmul.f32 %v2569_v57, %v2668_v26  ;;  %1551 = vmatprep.mubr.f32.mxu1 %v3579_v51  ;;  %v1096_v10 = vmax.f32 %v840_v15, 0.0  ;;  %v1082_v47 = vmax.f32 %v826_v41, 0.0  ;;  %v823_v52 = vadd.f32 %v2687_v1, %v471_v46 }
  0xe3   : > { %2036 = vmatpush1.bf16.msra.mxu0 %v2035_v37  ;;  %2068 = vmatpush1.bf16.msra.mxu1 %v2067_v12  ;;  %v489_v59 = vmul.f32 %v2569_v57, %v2666_v25  ;;  %v1098_v19 = vmax.f32 %v842_v21, 0.0  ;;  %v839_v11 = vadd.f32 %v2685_v0, %v487_v50  ;;  %v504_v2 = vmul.f32 %v2557_v54, %v2704_v32 }
  0xe4   : > { %v825_v24 = vadd.f32 %v2687_v1, %v473_v16  ;;  %v2037_v53 = vpack.c.bf16 %v1096_v10, %v1080_v7  ;;  %v1079_v39 = vmax.f32 %v823_v52, 0.0  ;;  %v520_v38 = vmul.f32 %v2557_v54, %v2702_v31 }
  0xe5   : > { %v841_v20 = vadd.f32 %v2685_v0, %v489_v59  ;;  %v2069_v5 = vpack.c.bf16 %v1098_v19, %v1082_v47  ;;  %v1095_v23 = vmax.f32 %v839_v11, 0.0  ;;  %v856_v4 = vadd.f32 %v2723_v18, %v504_v2 }
  0xe6   : > { %v1081_v13 = vmax.f32 %v825_v24, 0.0  ;;  %2038 = vmatprep.subr.bf16.mxu0 %v2037_v53  ;;  %v872_v43 = vadd.f32 %v2721_v8, %v520_v38  ;;  %v506_v33 = vmul.f32 %v2561_v55, %v2704_v32  ;;  %v522_v37 = vmul.f32 %v2561_v55, %v2702_v31 }
  0xe7   : > { %v1097_v44 = vmax.f32 %v841_v20, 0.0  ;;  %2070 = vmatprep.subr.bf16.mxu1 %v2069_v5  ;;  %v2039_v45 = vpack.c.bf16 %v1095_v23, %v1079_v39  ;;  %v1112_v35 = vmax.f32 %v856_v4, 0.0  ;;  %v503_v12 = vmul.f32 %v2565_v56, %v2704_v32 }
  0xe8   : > { %v519_v15 = vmul.f32 %v2565_v56, %v2702_v31  ;;  %v1128_v46 = vmax.f32 %v872_v43, 0.0  ;;  %v858_v7 = vadd.f32 %v2723_v18, %v506_v33  ;;  %v874_v21 = vadd.f32 %v2721_v8, %v522_v37 }
  0xe9   : > { %v2071_v41 = vpack.c.bf16 %v1097_v44, %v1081_v13  ;;  %2040 = vmatpush1.bf16.msra.mxu0 %v2039_v45  ;;  %v855_v50 = vadd.f32 %v2723_v18, %v503_v12  ;;  %v505_v10 = vmul.f32 %v2569_v57, %v2704_v32  ;;  %v521_v47 = vmul.f32 %v2569_v57, %v2702_v31 }
  0xea   : > { %v871_v16 = vadd.f32 %v2721_v8, %v519_v15  ;;  %v2041_v52 = vpack.c.bf16 %v1128_v46, %v1112_v35  ;;  %v1114_v59 = vmax.f32 %v858_v7, 0.0  ;;  %v1130_v19 = vmax.f32 %v874_v21, 0.0 }
  0xeb   : > { %2072 = vmatpush1.bf16.msra.mxu1 %v2071_v41  ;;  %v536_v11 = vmul.f32 %v2557_v54, %v2744_v42  ;;  %v1111_v24 = vmax.f32 %v855_v50, 0.0  ;;  %v857_v53 = vadd.f32 %v2723_v18, %v505_v10  ;;  %v873_v39 = vadd.f32 %v2721_v8, %v521_v47 }
  0xec   : > { %v1127_v2 = vmax.f32 %v871_v16, 0.0  ;;  %2042 = vmatprep.subr.bf16.mxu0 %v2041_v52  ;;  %v2073_v20 = vpack.c.bf16 %v1130_v19, %v1114_v59  ;;  %v552_v38 = vmul.f32 %v2557_v54, %v2742_v40  ;;  %v538_v23 = vmul.f32 %v2561_v55, %v2744_v42 }
  0xed   : > { %v888_v5 = vadd.f32 %v2763_v36, %v536_v11  ;;  %v1113_v4 = vmax.f32 %v857_v53, 0.0  ;;  %v1129_v44 = vmax.f32 %v873_v39, 0.0  ;;  %v554_v43 = vmul.f32 %v2561_v55, %v2742_v40 }
  0xee   : > { %v2043_v13 = vpack.c.bf16 %v1127_v2, %v1111_v24  ;;  %2074 = vmatprep.subr.bf16.mxu1 %v2073_v20  ;;  %v904_v33 = vadd.f32 %v2761_v34, %v552_v38  ;;  %v890_v45 = vadd.f32 %v2763_v36, %v538_v23  ;;  %v535_v35 = vmul.f32 %v2565_v56, %v2744_v42 }
  0xef   : > { %v1144_v37 = vmax.f32 %v888_v5, 0.0  ;;  %v2075_v12 = vpack.c.bf16 %v1129_v44, %v1113_v4  ;;  %v906_v15 = vadd.f32 %v2761_v34, %v554_v43  ;;  %v551_v41 = vmul.f32 %v2565_v56, %v2742_v40 }
  0xf0   : > { %2044 = vmatpush1.bf16.msra.mxu0 %v2043_v13  ;;  %v537_v46 = vmul.f32 %v2569_v57, %v2744_v42  ;;  %v1160_v7 = vmax.f32 %v904_v33, 0.0  ;;  %v1146_v21 = vmax.f32 %v890_v45, 0.0  ;;  %v887_v50 = vadd.f32 %v2763_v36, %v535_v35 }
  0xf1   : > { %v553_v16 = vmul.f32 %v2569_v57, %v2742_v40  ;;  %2076 = vmatpush1.bf16.msra.mxu1 %v2075_v12  ;;  %v1162_v10 = vmax.f32 %v906_v15, 0.0  ;;  %v903_v47 = vadd.f32 %v2761_v34, %v551_v41  ;;  %v568_v59 = vmul.f32 %v2557_v54, %v2783_v3 }
  0xf2   : > { %v889_v52 = vadd.f32 %v2763_v36, %v537_v46  ;;  %v2045_v19 = vpack.c.bf16 %v1160_v7, %v1144_v37  ;;  %v1143_v11 = vmax.f32 %v887_v50, 0.0  ;;  %v584_v2 = vmul.f32 %v2557_v54, %v2781_v49 }
  0xf3   : > { %v905_v24 = vadd.f32 %v2761_v34, %v553_v16  ;;  %v2077_v53 = vpack.c.bf16 %v1162_v10, %v1146_v21  ;;  %v1159_v39 = vmax.f32 %v903_v47, 0.0  ;;  %v920_v38 = vadd.f32 %v2802_v22, %v568_v59 }
  0xf4   : > { %v1145_v20 = vmax.f32 %v889_v52, 0.0  ;;  %2046 = vmatprep.subr.bf16.mxu0 %v2045_v19  ;;  %v936_v23 = vadd.f32 %v2800_v48, %v584_v2  ;;  %v570_v13 = vmul.f32 %v2561_v55, %v2783_v3  ;;  %v586_v4 = vmul.f32 %v2561_v55, %v2781_v49 }
  0xf5   : > { %v1161_v5 = vmax.f32 %v905_v24, 0.0  ;;  %2078 = vmatprep.subr.bf16.mxu1 %v2077_v53  ;;  %v2047_v44 = vpack.c.bf16 %v1159_v39, %v1143_v11  ;;  %v1176_v43 = vmax.f32 %v920_v38, 0.0  ;;  %v567_v33 = vmul.f32 %v2565_v56, %v2783_v3 }
  0xf6   : > { %v583_v37 = vmul.f32 %v2565_v56, %v2781_v49  ;;  %v1192_v35 = vmax.f32 %v936_v23, 0.0  ;;  %v922_v12 = vadd.f32 %v2802_v22, %v570_v13  ;;  %v938_v15 = vadd.f32 %v2800_v48, %v586_v4 }
  0xf7   : > { %v2079_v45 = vpack.c.bf16 %v1161_v5, %v1145_v20  ;;  %2048 = vmatpush1.bf16.msra.mxu0 %v2047_v44  ;;  %v919_v41 = vadd.f32 %v2802_v22, %v567_v33  ;;  %v569_v7 = vmul.f32 %v2569_v57, %v2783_v3  ;;  %v585_v21 = vmul.f32 %v2569_v57, %v2781_v49 }
  0xf8   : > { %v935_v46 = vadd.f32 %v2800_v48, %v583_v37  ;;  %v2049_v50 = vpack.c.bf16 %v1192_v35, %v1176_v43  ;;  %v1178_v16 = vmax.f32 %v922_v12, 0.0  ;;  %v1194_v10 = vmax.f32 %v938_v15, 0.0 }
  0xf9   : > { %2080 = vmatpush1.bf16.msra.mxu1 %v2079_v45  ;;  %v600_v47 = vmul.f32 %v2557_v54, %v2821_v28  ;;  %v1175_v52 = vmax.f32 %v919_v41, 0.0  ;;  %v921_v19 = vadd.f32 %v2802_v22, %v569_v7  ;;  %v937_v11 = vadd.f32 %v2800_v48, %v585_v21 }
  0xfa   : > { %v1191_v59 = vmax.f32 %v935_v46, 0.0  ;;  %2050 = vmatprep.subr.bf16.mxu0 %v2049_v50  ;;  %v2081_v24 = vpack.c.bf16 %v1194_v10, %v1178_v16  ;;  %v616_v2 = vmul.f32 %v2557_v54, %v2819_v6  ;;  %v602_v39 = vmul.f32 %v2561_v55, %v2821_v28 }
  0xfb   : > { %v952_v53 = vadd.f32 %v2839_v17, %v600_v47  ;;  %v1177_v38 = vmax.f32 %v921_v19, 0.0  ;;  %v1193_v5 = vmax.f32 %v937_v11, 0.0  ;;  %v618_v23 = vmul.f32 %v2561_v55, %v2819_v6 }
  0xfc   : > { %v2051_v20 = vpack.c.bf16 %v1191_v59, %v1175_v52  ;;  %2082 = vmatprep.subr.bf16.mxu1 %v2081_v24  ;;  %v968_v13 = vadd.f32 %v2837_v27, %v616_v2  ;;  %v954_v44 = vadd.f32 %v2839_v17, %v602_v39  ;;  %v599_v43 = vmul.f32 %v2565_v56, %v2821_v28 }
  0xfd   : > { %v1208_v4 = vmax.f32 %v952_v53, 0.0  ;;  %v2083_v33 = vpack.c.bf16 %v1193_v5, %v1177_v38  ;;  %v970_v37 = vadd.f32 %v2837_v27, %v618_v23  ;;  %v615_v45 = vmul.f32 %v2565_v56, %v2819_v6 }
  0xfe   : > { %2052 = vmatpush1.bf16.msra.mxu0 %v2051_v20  ;;  %v601_v35 = vmul.f32 %v2569_v57, %v2821_v28  ;;  %v1224_v12 = vmax.f32 %v968_v13, 0.0  ;;  %v1210_v15 = vmax.f32 %v954_v44, 0.0  ;;  %v951_v41 = vadd.f32 %v2839_v17, %v599_v43 }
  0xff   : > { %v617_v46 = vmul.f32 %v2569_v57, %v2819_v6  ;;  %2084 = vmatpush1.bf16.msra.mxu1 %v2083_v33  ;;  %v1226_v7 = vmax.f32 %v970_v37, 0.0  ;;  %v967_v21 = vadd.f32 %v2837_v27, %v615_v45  ;;  %v632_v16 = vmul.f32 %v2557_v54, %v2856_v61 }
 0x100   : > { %v953_v50 = vadd.f32 %v2839_v17, %v601_v35  ;;  %v2053_v10 = vpack.c.bf16 %v1224_v12, %v1208_v4  ;;  %v1207_v47 = vmax.f32 %v951_v41, 0.0  ;;  %v648_v59 = vmul.f32 %v2557_v54, %v2854_v14  ;;  %v3580_v41 = vld [vmem:[#allocation10_spill] sm:$0xff] }
 0x101   : > { %v969_v52 = vadd.f32 %v2837_v27, %v617_v46  ;;  %v2085_v19 = vpack.c.bf16 %v1226_v7, %v1210_v15  ;;  %v1223_v11 = vmax.f32 %v967_v21, 0.0  ;;  %v984_v2 = vadd.f32 %v2875_v60, %v632_v16  ;;  %v3581_v46 = vld [vmem:[#allocation8_spill] sm:$0xff] }
 0x102   : > { %v1209_v24 = vmax.f32 %v953_v50, 0.0  ;;  %2054 = vmatprep.subr.bf16.mxu0 %v2053_v10  ;;  %v1000_v39 = vadd.f32 %v2873_v9, %v648_v59  ;;  %v634_v20 = vmul.f32 %v2561_v55, %v2856_v61  ;;  %v650_v38 = vmul.f32 %v2561_v55, %v2854_v14 }
 0x103   : > { %v1225_v53 = vmax.f32 %v969_v52, 0.0  ;;  %2086 = vmatprep.subr.bf16.mxu1 %v2085_v19  ;;  %v2055_v5 = vpack.c.bf16 %v1223_v11, %v1207_v47  ;;  %v1240_v23 = vmax.f32 %v984_v2, 0.0  ;;  %v631_v54 = vmul.f32 %v2565_v56, %v2856_v61  ;;  %v3582_v52 = vld [vmem:[#allocation12_spill] sm:$0xff]  ;;  %v3583_v19 = vld [vmem:[#allocation9_spill] sm:$0xff] }
 0x104   : > { %v647_v13 = vmul.f32 %v2565_v56, %v2854_v14  ;;  %v1256_v44 = vmax.f32 %v1000_v39, 0.0  ;;  %v986_v43 = vadd.f32 %v2875_v60, %v634_v20  ;;  %v1002_v33 = vadd.f32 %v2873_v9, %v650_v38  ;;  %v3584_v11 = vld [vmem:[#allocation13_spill] sm:$0xff]  ;;  %v3585_v38 = vld [vmem:[#allocation11_spill] sm:$0xff] }
 0x105   : > { %v2087_v4 = vpack.c.bf16 %v1225_v53, %v1209_v24  ;;  %2056 = vmatpush1.bf16.msra.mxu0 %v2055_v5  ;;  %v983_v37 = vadd.f32 %v2875_v60, %v631_v54  ;;  %v633_v45 = vmul.f32 %v2569_v57, %v2856_v61  ;;  %v649_v35 = vmul.f32 %v2569_v57, %v2854_v14 }
 0x106   : > { %v999_v55 = vadd.f32 %v2873_v9, %v647_v13  ;;  %v2057_v12 = vpack.c.bf16 %v1256_v44, %v1240_v23  ;;  %v1242_v56 = vmax.f32 %v986_v43, 0.0  ;;  %v1258_v15 = vmax.f32 %v1002_v33, 0.0  ;;  %v3586_v13 = vld [vmem:[#allocation6_spill] sm:$0xff] }
 0x107   : > { %2088 = vmatpush1.bf16.msra.mxu1 %v2087_v4  ;;  %v412_v7 = vmul.f32 %v3581_v46, %v3580_v41  ;;  %v1239_v21 = vmax.f32 %v983_v37, 0.0  ;;  %v985_v16 = vadd.f32 %v2875_v60, %v633_v45  ;;  %v1001_v10 = vadd.f32 %v2873_v9, %v649_v35  ;;  %v3587_v37 = vld [vmem:[#allocation7_spill] sm:$0xff] }
 0x108   : > { %v1255_v50 = vmax.f32 %v999_v55, 0.0  ;;  %2058 = vmatprep.subr.bf16.mxu0 %v2057_v12  ;;  %v2089_v47 = vpack.c.bf16 %v1258_v15, %v1242_v56  ;;  %v428_v59 = vmul.f32 %v3581_v46, %v3582_v52  ;;  %v414_v24 = vmul.f32 %v3584_v11, %v3580_v41 }
 0x109   : > { %v764_v57 = vadd.f32 %v3583_v19, %v412_v7  ;;  %v1241_v53 = vmax.f32 %v985_v16, 0.0  ;;  %v1257_v39 = vmax.f32 %v1001_v10, 0.0  ;;  %v430_v20 = vmul.f32 %v3584_v11, %v3582_v52 }
 0x10a   : > { %v2059_v2 = vpack.c.bf16 %v1255_v50, %v1239_v21  ;;  %2090 = vmatprep.subr.bf16.mxu1 %v2089_v47  ;;  %v780_v5 = vadd.f32 %v3585_v38, %v428_v59  ;;  %v766_v54 = vadd.f32 %v3583_v19, %v414_v24  ;;  %v411_v4 = vmul.f32 %v3586_v13, %v3580_v41 }
 0x10b   : > { %v1020_v23 = vmax.f32 %v764_v57, 0.0  ;;  %v2091_v44 = vpack.c.bf16 %v1257_v39, %v1241_v53  ;;  %v782_v43 = vadd.f32 %v3585_v38, %v430_v20  ;;  %v427_v33 = vmul.f32 %v3586_v13, %v3582_v52 }
 0x10c   : > { %2060 = vmatpush1.bf16.msra.mxu0 %v2059_v2  ;;  %v413_v55 = vmul.f32 %v3587_v37, %v3580_v41  ;;  %v1036_v45 = vmax.f32 %v780_v5, 0.0  ;;  %v1022_v35 = vmax.f32 %v766_v54, 0.0  ;;  %v763_v12 = vadd.f32 %v3583_v19, %v411_v4 }
 0x10d   : > { %v429_v56 = vmul.f32 %v3587_v37, %v3582_v52  ;;  %2092 = vmatpush1.bf16.msra.mxu1 %v2091_v44  ;;  %v1038_v15 = vmax.f32 %v782_v43, 0.0  ;;  %v779_v7 = vadd.f32 %v3585_v38, %v427_v33  ;;  %v444_v50 = vmul.f32 %v3581_v46, %v2629_v30 }
 0x10e   : > { %v765_v21 = vadd.f32 %v3583_v19, %v413_v55  ;;  %v2093_v16 = vpack.c.bf16 %v1036_v45, %v1020_v23  ;;  %v1019_v10 = vmax.f32 %v763_v12, 0.0  ;;  %v460_v59 = vmul.f32 %v3581_v46, %v2627_v29 }
 0x10f   : > { %1481 = vmatmul.mubr.f32.vlgmr.msra.gmra.mrb[2].mxu0 %v2904_v58  ;;  %v781_v47 = vadd.f32 %v3585_v38, %v429_v56  ;;  %v2125_v57 = vpack.c.bf16 %v1038_v15, %v1022_v35  ;;  %v1035_v24 = vmax.f32 %v779_v7, 0.0  ;;  %v796_v53 = vadd.f32 %v2653_v63, %v444_v50 }
 0x110   : > { %v1021_v2 = vmax.f32 %v765_v21, 0.0  ;;  %1622 = vmatprep.mubr.f32.mxu0 %v3579_v51  ;;  %2094 = vmatprep.subr.bf16.mxu0 %v2093_v16  ;;  %v812_v20 = vadd.f32 %v2651_v62, %v460_v59  ;;  %v446_v5 = vmul.f32 %v3584_v11, %v2629_v30  ;;  %v462_v23 = vmul.f32 %v3584_v11, %v2627_v29 }
 0x111   : > { %1552 = vmatmul.mubr.f32.vlgmr.msra.gmra.mrb[2].mxu1 %v2904_v58  ;;  %v1037_v39 = vmax.f32 %v781_v47, 0.0  ;;  %2126 = vmatprep.subr.bf16.mxu1 %v2125_v57  ;;  %v2095_v54 = vpack.c.bf16 %v1035_v24, %v1019_v10  ;;  %v1052_v4 = vmax.f32 %v796_v53, 0.0  ;;  %v443_v44 = vmul.f32 %v3586_v13, %v2629_v30 }
 0x112   : > { %v459_v43 = vmul.f32 %v3586_v13, %v2627_v29  ;;  %1693 = vmatprep.mubr.f32.mxu1 %v3579_v51  ;;  %v1068_v55 = vmax.f32 %v812_v20, 0.0  ;;  %v798_v45 = vadd.f32 %v2653_v63, %v446_v5  ;;  %v814_v35 = vadd.f32 %v2651_v62, %v462_v23 }
 0x113   : > { %v2127_v33 = vpack.c.bf16 %v1037_v39, %v1021_v2  ;;  %2096 = vmatpush1.bf16.msra.mxu0 %v2095_v54  ;;  %v795_v12 = vadd.f32 %v2653_v63, %v443_v44  ;;  %v445_v15 = vmul.f32 %v3587_v37, %v2629_v30  ;;  %v461_v7 = vmul.f32 %v3587_v37, %v2627_v29 }
 0x114   : > { %v811_v56 = vadd.f32 %v2651_v62, %v459_v43  ;;  %v2097_v21 = vpack.c.bf16 %v1068_v55, %v1052_v4  ;;  %v1054_v50 = vmax.f32 %v798_v45, 0.0  ;;  %v1070_v16 = vmax.f32 %v814_v35, 0.0 }
 0x115   : > { %2128 = vmatpush1.bf16.msra.mxu1 %v2127_v33  ;;  %v476_v10 = vmul.f32 %v3581_v46, %v2668_v26  ;;  %v1051_v47 = vmax.f32 %v795_v12, 0.0  ;;  %v797_v57 = vadd.f32 %v2653_v63, %v445_v15  ;;  %v813_v24 = vadd.f32 %v2651_v62, %v461_v7 }
 0x116   : > { %v1067_v59 = vmax.f32 %v811_v56, 0.0  ;;  %2098 = vmatprep.subr.bf16.mxu0 %v2097_v21  ;;  %v2129_v2 = vpack.c.bf16 %v1070_v16, %v1054_v50  ;;  %v492_v53 = vmul.f32 %v3581_v46, %v2666_v25  ;;  %v478_v20 = vmul.f32 %v3584_v11, %v2668_v26 }
 0x117   : > { %v828_v39 = vadd.f32 %v2687_v1, %v476_v10  ;;  %v1053_v23 = vmax.f32 %v797_v57, 0.0  ;;  %v1069_v54 = vmax.f32 %v813_v24, 0.0  ;;  %v494_v4 = vmul.f32 %v3584_v11, %v2666_v25 }
 0x118   : > { %v2099_v5 = vpack.c.bf16 %v1067_v59, %v1051_v47  ;;  %2130 = vmatprep.subr.bf16.mxu1 %v2129_v2  ;;  %v844_v44 = vadd.f32 %v2685_v0, %v492_v53  ;;  %v830_v33 = vadd.f32 %v2687_v1, %v478_v20  ;;  %v475_v55 = vmul.f32 %v3586_v13, %v2668_v26 }
 0x119   : > { %v1084_v43 = vmax.f32 %v828_v39, 0.0  ;;  %v2131_v45 = vpack.c.bf16 %v1069_v54, %v1053_v23  ;;  %v846_v35 = vadd.f32 %v2685_v0, %v494_v4  ;;  %v491_v12 = vmul.f32 %v3586_v13, %v2666_v25 }
 0x11a   : > { %2100 = vmatpush1.bf16.msra.mxu0 %v2099_v5  ;;  %v477_v56 = vmul.f32 %v3587_v37, %v2668_v26  ;;  %v1100_v15 = vmax.f32 %v844_v44, 0.0  ;;  %v1086_v7 = vmax.f32 %v830_v33, 0.0  ;;  %v827_v21 = vadd.f32 %v2687_v1, %v475_v55 }
 0x11b   : > { %v493_v50 = vmul.f32 %v3587_v37, %v2666_v25  ;;  %2132 = vmatpush1.bf16.msra.mxu1 %v2131_v45  ;;  %v1102_v16 = vmax.f32 %v846_v35, 0.0  ;;  %v843_v10 = vadd.f32 %v2685_v0, %v491_v12  ;;  %v508_v59 = vmul.f32 %v3581_v46, %v2704_v32 }
 0x11c   : > { %v829_v47 = vadd.f32 %v2687_v1, %v477_v56  ;;  %v2101_v57 = vpack.c.bf16 %v1100_v15, %v1084_v43  ;;  %v1083_v24 = vmax.f32 %v827_v21, 0.0  ;;  %v524_v53 = vmul.f32 %v3581_v46, %v2702_v31 }
 0x11d   : > { %v845_v2 = vadd.f32 %v2685_v0, %v493_v50  ;;  %v2133_v39 = vpack.c.bf16 %v1102_v16, %v1086_v7  ;;  %v1099_v20 = vmax.f32 %v843_v10, 0.0  ;;  %v860_v23 = vadd.f32 %v2723_v18, %v508_v59 }
 0x11e   : > { %v1085_v5 = vmax.f32 %v829_v47, 0.0  ;;  %2102 = vmatprep.subr.bf16.mxu0 %v2101_v57  ;;  %v876_v4 = vadd.f32 %v2721_v8, %v524_v53  ;;  %v510_v44 = vmul.f32 %v3584_v11, %v2704_v32  ;;  %v526_v43 = vmul.f32 %v3584_v11, %v2702_v31 }
 0x11f   : > { %v1101_v54 = vmax.f32 %v845_v2, 0.0  ;;  %2134 = vmatprep.subr.bf16.mxu1 %v2133_v39  ;;  %v2103_v33 = vpack.c.bf16 %v1099_v20, %v1083_v24  ;;  %v1116_v55 = vmax.f32 %v860_v23, 0.0  ;;  %v507_v45 = vmul.f32 %v3586_v13, %v2704_v32 }
 0x120   : > { %v523_v35 = vmul.f32 %v3586_v13, %v2702_v31  ;;  %v1132_v56 = vmax.f32 %v876_v4, 0.0  ;;  %v862_v15 = vadd.f32 %v2723_v18, %v510_v44  ;;  %v878_v7 = vadd.f32 %v2721_v8, %v526_v43 }
 0x121   : > { %v2135_v12 = vpack.c.bf16 %v1101_v54, %v1085_v5  ;;  %2104 = vmatpush1.bf16.msra.mxu0 %v2103_v33  ;;  %v859_v21 = vadd.f32 %v2723_v18, %v507_v45  ;;  %v509_v16 = vmul.f32 %v3587_v37, %v2704_v32  ;;  %v525_v10 = vmul.f32 %v3587_v37, %v2702_v31 }
 0x122   : > { %v875_v50 = vadd.f32 %v2721_v8, %v523_v35  ;;  %v2105_v47 = vpack.c.bf16 %v1132_v56, %v1116_v55  ;;  %v1118_v59 = vmax.f32 %v862_v15, 0.0  ;;  %v1134_v57 = vmax.f32 %v878_v7, 0.0 }
 0x123   : > { %2136 = vmatpush1.bf16.msra.mxu1 %v2135_v12  ;;  %v540_v24 = vmul.f32 %v3581_v46, %v2744_v42  ;;  %v1115_v2 = vmax.f32 %v859_v21, 0.0  ;;  %v861_v39 = vadd.f32 %v2723_v18, %v509_v16  ;;  %v877_v20 = vadd.f32 %v2721_v8, %v525_v10 }
 0x124   : > { %v1131_v53 = vmax.f32 %v875_v50, 0.0  ;;  %2106 = vmatprep.subr.bf16.mxu0 %v2105_v47  ;;  %v2137_v5 = vpack.c.bf16 %v1134_v57, %v1118_v59  ;;  %v556_v23 = vmul.f32 %v3581_v46, %v2742_v40  ;;  %v542_v4 = vmul.f32 %v3584_v11, %v2744_v42 }
 0x125   : > { %v892_v54 = vadd.f32 %v2763_v36, %v540_v24  ;;  %v1117_v43 = vmax.f32 %v861_v39, 0.0  ;;  %v1133_v33 = vmax.f32 %v877_v20, 0.0  ;;  %v558_v55 = vmul.f32 %v3584_v11, %v2742_v40 }
 0x126   : > { %v2107_v44 = vpack.c.bf16 %v1131_v53, %v1115_v2  ;;  %2138 = vmatprep.subr.bf16.mxu1 %v2137_v5  ;;  %v908_v45 = vadd.f32 %v2761_v34, %v556_v23  ;;  %v894_v12 = vadd.f32 %v2763_v36, %v542_v4  ;;  %v539_v56 = vmul.f32 %v3586_v13, %v2744_v42 }
 0x127   : > { %v1148_v35 = vmax.f32 %v892_v54, 0.0  ;;  %v2139_v15 = vpack.c.bf16 %v1133_v33, %v1117_v43  ;;  %v910_v7 = vadd.f32 %v2761_v34, %v558_v55  ;;  %v555_v21 = vmul.f32 %v3586_v13, %v2742_v40 }
 0x128   : > { %2108 = vmatpush1.bf16.msra.mxu0 %v2107_v44  ;;  %v541_v50 = vmul.f32 %v3587_v37, %v2744_v42  ;;  %v1164_v16 = vmax.f32 %v908_v45, 0.0  ;;  %v1150_v10 = vmax.f32 %v894_v12, 0.0  ;;  %v891_v47 = vadd.f32 %v2763_v36, %v539_v56 }
 0x129   : > { %v557_v59 = vmul.f32 %v3587_v37, %v2742_v40  ;;  %2140 = vmatpush1.bf16.msra.mxu1 %v2139_v15  ;;  %v1166_v57 = vmax.f32 %v910_v7, 0.0  ;;  %v907_v24 = vadd.f32 %v2761_v34, %v555_v21  ;;  %v572_v53 = vmul.f32 %v3581_v46, %v2783_v3 }
 0x12a   : > { %v893_v2 = vadd.f32 %v2763_v36, %v541_v50  ;;  %v2109_v39 = vpack.c.bf16 %v1164_v16, %v1148_v35  ;;  %v1147_v20 = vmax.f32 %v891_v47, 0.0  ;;  %v588_v23 = vmul.f32 %v3581_v46, %v2781_v49 }
 0x12b   : > { %v909_v5 = vadd.f32 %v2761_v34, %v557_v59  ;;  %v2141_v54 = vpack.c.bf16 %v1166_v57, %v1150_v10  ;;  %v1163_v4 = vmax.f32 %v907_v24, 0.0  ;;  %v924_v43 = vadd.f32 %v2802_v22, %v572_v53 }
 0x12c   : > { %v1149_v44 = vmax.f32 %v893_v2, 0.0  ;;  %2110 = vmatprep.subr.bf16.mxu0 %v2109_v39  ;;  %v940_v55 = vadd.f32 %v2800_v48, %v588_v23  ;;  %v574_v45 = vmul.f32 %v3584_v11, %v2783_v3  ;;  %v590_v35 = vmul.f32 %v3584_v11, %v2781_v49 }
 0x12d   : > { %v1165_v33 = vmax.f32 %v909_v5, 0.0  ;;  %2142 = vmatprep.subr.bf16.mxu1 %v2141_v54  ;;  %v2111_v12 = vpack.c.bf16 %v1163_v4, %v1147_v20  ;;  %v1180_v56 = vmax.f32 %v924_v43, 0.0  ;;  %v571_v15 = vmul.f32 %v3586_v13, %v2783_v3 }
 0x12e   : > { %v587_v7 = vmul.f32 %v3586_v13, %v2781_v49  ;;  %v1196_v50 = vmax.f32 %v940_v55, 0.0  ;;  %v926_v16 = vadd.f32 %v2802_v22, %v574_v45  ;;  %v942_v10 = vadd.f32 %v2800_v48, %v590_v35 }
 0x12f   : > { %v2143_v21 = vpack.c.bf16 %v1165_v33, %v1149_v44  ;;  %2112 = vmatpush1.bf16.msra.mxu0 %v2111_v12  ;;  %v923_v47 = vadd.f32 %v2802_v22, %v571_v15  ;;  %v573_v57 = vmul.f32 %v3587_v37, %v2783_v3  ;;  %v589_v24 = vmul.f32 %v3587_v37, %v2781_v49 }
 0x130   : > { %v939_v59 = vadd.f32 %v2800_v48, %v587_v7  ;;  %v2113_v2 = vpack.c.bf16 %v1196_v50, %v1180_v56  ;;  %v1182_v53 = vmax.f32 %v926_v16, 0.0  ;;  %v1198_v39 = vmax.f32 %v942_v10, 0.0 }
 0x131   : > { %2144 = vmatpush1.bf16.msra.mxu1 %v2143_v21  ;;  %v604_v20 = vmul.f32 %v3581_v46, %v2821_v28  ;;  %v1179_v5 = vmax.f32 %v923_v47, 0.0  ;;  %v925_v54 = vadd.f32 %v2802_v22, %v573_v57  ;;  %v941_v4 = vadd.f32 %v2800_v48, %v589_v24 }
 0x132   : > { %v1195_v23 = vmax.f32 %v939_v59, 0.0  ;;  %2114 = vmatprep.subr.bf16.mxu0 %v2113_v2  ;;  %v2145_v44 = vpack.c.bf16 %v1198_v39, %v1182_v53  ;;  %v620_v43 = vmul.f32 %v3581_v46, %v2819_v6  ;;  %v606_v55 = vmul.f32 %v3584_v11, %v2821_v28 }
 0x133   : > { %v956_v33 = vadd.f32 %v2839_v17, %v604_v20  ;;  %v1181_v35 = vmax.f32 %v925_v54, 0.0  ;;  %v1197_v12 = vmax.f32 %v941_v4, 0.0  ;;  %v622_v56 = vmul.f32 %v3584_v11, %v2819_v6 }
 0x134   : > { %v2115_v45 = vpack.c.bf16 %v1195_v23, %v1179_v5  ;;  %2146 = vmatprep.subr.bf16.mxu1 %v2145_v44  ;;  %v972_v15 = vadd.f32 %v2837_v27, %v620_v43  ;;  %v958_v21 = vadd.f32 %v2839_v17, %v606_v55  ;;  %v603_v50 = vmul.f32 %v3586_v13, %v2821_v28 }
 0x135   : > { %v1212_v7 = vmax.f32 %v956_v33, 0.0  ;;  %v2147_v16 = vpack.c.bf16 %v1197_v12, %v1181_v35  ;;  %v974_v10 = vadd.f32 %v2837_v27, %v622_v56  ;;  %v619_v47 = vmul.f32 %v3586_v13, %v2819_v6 }
 0x136   : > { %2116 = vmatpush1.bf16.msra.mxu0 %v2115_v45  ;;  %v605_v59 = vmul.f32 %v3587_v37, %v2821_v28  ;;  %v1228_v57 = vmax.f32 %v972_v15, 0.0  ;;  %v1214_v24 = vmax.f32 %v958_v21, 0.0  ;;  %v955_v2 = vadd.f32 %v2839_v17, %v603_v50 }
 0x137   : > { %v621_v53 = vmul.f32 %v3587_v37, %v2819_v6  ;;  %2148 = vmatpush1.bf16.msra.mxu1 %v2147_v16  ;;  %v1230_v39 = vmax.f32 %v974_v10, 0.0  ;;  %v971_v20 = vadd.f32 %v2837_v27, %v619_v47  ;;  %v636_v23 = vmul.f32 %v3581_v46, %v2856_v61 }
 0x138   : > { %v957_v5 = vadd.f32 %v2839_v17, %v605_v59  ;;  %v2117_v54 = vpack.c.bf16 %v1228_v57, %v1212_v7  ;;  %v1211_v4 = vmax.f32 %v955_v2, 0.0  ;;  %v652_v43 = vmul.f32 %v3581_v46, %v2854_v14 }
 0x139   : > { %v973_v44 = vadd.f32 %v2837_v27, %v621_v53  ;;  %v2149_v33 = vpack.c.bf16 %v1230_v39, %v1214_v24  ;;  %v1227_v55 = vmax.f32 %v971_v20, 0.0  ;;  %v988_v35 = vadd.f32 %v2875_v60, %v636_v23 }
 0x13a   : > { %v1213_v45 = vmax.f32 %v957_v5, 0.0  ;;  %2118 = vmatprep.subr.bf16.mxu0 %v2117_v54  ;;  %v1004_v56 = vadd.f32 %v2873_v9, %v652_v43  ;;  %v638_v15 = vmul.f32 %v3584_v11, %v2856_v61  ;;  %v654_v7 = vmul.f32 %v3584_v11, %v2854_v14  ;;  %v3588_v5 = vld [vmem:[#allocation14_spill] sm:$0xff] }
 0x13b   : > { %v1229_v12 = vmax.f32 %v973_v44, 0.0  ;;  %2150 = vmatprep.subr.bf16.mxu1 %v2149_v33  ;;  %v2119_v21 = vpack.c.bf16 %v1227_v55, %v1211_v4  ;;  %v1244_v50 = vmax.f32 %v988_v35, 0.0  ;;  %v635_v46 = vmul.f32 %v3586_v13, %v2856_v61  ;;  %v3589_v35 = vld [vmem:[#allocation5_spill] sm:$0xff] }
 0x13c   : > { %v651_v16 = vmul.f32 %v3586_v13, %v2854_v14  ;;  %v1260_v47 = vmax.f32 %v1004_v56, 0.0  ;;  %v990_v59 = vadd.f32 %v2875_v60, %v638_v15  ;;  %v1006_v57 = vadd.f32 %v2873_v9, %v654_v7 }
 0x13d   : > { %v2151_v10 = vpack.c.bf16 %v1229_v12, %v1213_v45  ;;  %2120 = vmatpush1.bf16.msra.mxu0 %v2119_v21  ;;  %v987_v24 = vadd.f32 %v2875_v60, %v635_v46  ;;  %v637_v2 = vmul.f32 %v3587_v37, %v2856_v61  ;;  %v653_v53 = vmul.f32 %v3587_v37, %v2854_v14  ;;  %v2264_v45 = vld [vmem:[%s2435_s26 + $0x8] sm:$0xff] }
 0x13e   : > { %v1003_v11 = vadd.f32 %v2873_v9, %v651_v16  ;;  %v2121_v13 = vpack.c.bf16 %v1260_v47, %v1244_v50  ;;  %v1246_v39 = vmax.f32 %v990_v59, 0.0  ;;  %v1262_v20 = vmax.f32 %v1006_v57, 0.0 }
 0x13f   : > { %2152 = vmatpush1.bf16.msra.mxu1 %v2151_v10  ;;  %v416_v23 = vmul.f32 %v3588_v5, %v3580_v41  ;;  %v1243_v54 = vmax.f32 %v987_v24, 0.0  ;;  %v989_v44 = vadd.f32 %v2875_v60, %v637_v2  ;;  %v1005_v43 = vadd.f32 %v2873_v9, %v653_v53 }
 0x140   : > { %v1259_v4 = vmax.f32 %v1003_v11, 0.0  ;;  %2122 = vmatprep.subr.bf16.mxu0 %v2121_v13  ;;  %v2153_v33 = vpack.c.bf16 %v1262_v20, %v1246_v39  ;;  %v432_v55 = vmul.f32 %v3588_v5, %v3582_v52  ;;  %v3590_v12 = vsub.s32 7, %v3589_v35 }
 0x141   : > { %v768_v37 = vadd.f32 %v3583_v19, %v416_v23  ;;  %v1245_v7 = vmax.f32 %v989_v44, 0.0  ;;  %v1261_v21 = vmax.f32 %v1005_v43, 0.0  ;;  %v3591_v50 = vsub.s32 4, %v3589_v35 }
 0x142   : > { %v3271_v56 = vrot.slane %v2264_v45, %v3590_v12  ;;  %v2123_v15 = vpack.c.bf16 %v1259_v4, %v1243_v54  ;;  %2154 = vmatprep.subr.bf16.mxu1 %v2153_v33  ;;  %v784_v16 = vadd.f32 %v3585_v38, %v432_v55  ;;  %v3592_v2 = vsub.s32 6, %v3589_v35 }
 0x143   : > { %v3275_v46 = vrot.slane %v2264_v45, %v3591_v50  ;;  %v1024_v10 = vmax.f32 %v768_v37, 0.0  ;;  %v2155_v57 = vpack.c.bf16 %v1261_v21, %v1245_v7  ;;  %v448_v23 = vmul.f32 %v3588_v5, %v2629_v30 }
 0x144   : > { %v418_v47 = vmul.f32 %v3271_v56, %v3580_v41  ;;  %v434_v59 = vmul.f32 %v3271_v56, %v3582_v52  ;;  %2124 = vmatpush1.bf16.msra.mxu0 %v2123_v15  ;;  %v3288_v53 = vrot.slane %v2264_v45, %v3592_v2  ;;  %v1040_v13 = vmax.f32 %v784_v16, 0.0 }
 0x145   : > { %v415_v24 = vmul.f32 %v3275_v46, %v3580_v41  ;;  %v431_v11 = vmul.f32 %v3275_v46, %v3582_v52  ;;  %2156 = vmatpush1.bf16.msra.mxu1 %v2155_v57  ;;  %v464_v45 = vmul.f32 %v3588_v5, %v2627_v29  ;;  %v447_v57 = vmul.f32 %v3275_v46, %v2629_v30 }
 0x146   : > { %v770_v39 = vadd.f32 %v3583_v19, %v418_v47  ;;  %v786_v20 = vadd.f32 %v3585_v38, %v434_v59  ;;  %v417_v44 = vmul.f32 %v3288_v53, %v3580_v41  ;;  %v433_v43 = vmul.f32 %v3288_v53, %v3582_v52  ;;  %v3309_v52 = vld [vmem:[%s3544_s3] sm:$0xf] }
 0x147   : > { %v767_v54 = vadd.f32 %v3583_v19, %v415_v24  ;;  %v783_v4 = vadd.f32 %v3585_v38, %v431_v11  ;;  %v2157_v33 = vpack.c.bf16 %v1040_v13, %v1024_v10  ;;  %1623 = vmatmul.mubr.f32.vlgmr.msra.gmra.mrb[4].mxu0 %v2904_v58  ;;  %v800_v58 = vadd.f32 %v2653_v63, %v448_v23 }
 0x148   : > { %v1026_v55 = vmax.f32 %v770_v39, 0.0  ;;  %v1042_v37 = vmax.f32 %v786_v20, 0.0  ;;  %v769_v15 = vadd.f32 %v3583_v19, %v417_v44  ;;  %v785_v7 = vadd.f32 %v3585_v38, %v433_v43  ;;  %1764 = vmatprep.mubr.f32.mxu0 %v3579_v51  ;;  %1694 = vmatmul.mubr.f32.vlgmr.msra.gmra.mrb[4].mxu1 %v3309_v52 }
 0x149   : > { %v1023_v35 = vmax.f32 %v767_v54, 0.0  ;;  %v1039_v12 = vmax.f32 %v783_v4, 0.0  ;;  %2158 = vmatprep.subr.bf16.mxu0 %v2157_v33  ;;  %v816_v21 = vadd.f32 %v2651_v62, %v464_v45  ;;  %v450_v38 = vmul.f32 %v3271_v56, %v2629_v30  ;;  %1835 = vmatprep.mubr.f32.mxu1 %v3579_v51 }
 0x14a   : > { %v2189_v41 = vpack.c.bf16 %v1042_v37, %v1026_v55  ;;  %v1025_v16 = vmax.f32 %v769_v15, 0.0  ;;  %v1041_v19 = vmax.f32 %v785_v7, 0.0  ;;  %v1056_v10 = vmax.f32 %v800_v58, 0.0 }
 0x14b   : > { %v2159_v50 = vpack.c.bf16 %v1039_v12, %v1023_v35  ;;  %v1072_v47 = vmax.f32 %v816_v21, 0.0  ;;  %v466_v59 = vmul.f32 %v3271_v56, %v2627_v29  ;;  %v802_v11 = vadd.f32 %v2653_v63, %v450_v38 }
 0x14c   : > { %2190 = vmatprep.subr.bf16.mxu1 %v2189_v41  ;;  %v2191_v24 = vpack.c.bf16 %v1041_v19, %v1025_v16  ;;  %v463_v2 = vmul.f32 %v3275_v46, %v2627_v29  ;;  %v449_v13 = vmul.f32 %v3288_v53, %v2629_v30  ;;  %v799_v20 = vadd.f32 %v2653_v63, %v447_v57 }
 0x14d   : > { %2160 = vmatpush1.bf16.msra.mxu0 %v2159_v50  ;;  %v2161_v51 = vpack.c.bf16 %v1072_v47, %v1056_v10  ;;  %v818_v39 = vadd.f32 %v2651_v62, %v466_v59  ;;  %v465_v23 = vmul.f32 %v3288_v53, %v2627_v29  ;;  %v1058_v54 = vmax.f32 %v802_v11, 0.0 }
 0x14e   : > { %2192 = vmatpush1.bf16.msra.mxu1 %v2191_v24  ;;  %v815_v4 = vadd.f32 %v2651_v62, %v463_v2  ;;  %v801_v44 = vadd.f32 %v2653_v63, %v449_v13  ;;  %v480_v43 = vmul.f32 %v3588_v5, %v2668_v26  ;;  %v1055_v30 = vmax.f32 %v799_v20, 0.0 }
 0x14f   : > { %2162 = vmatprep.subr.bf16.mxu0 %v2161_v51  ;;  %v1074_v33 = vmax.f32 %v818_v39, 0.0  ;;  %v817_v55 = vadd.f32 %v2651_v62, %v465_v23  ;;  %v496_v37 = vmul.f32 %v3588_v5, %v2666_v25  ;;  %v482_v12 = vmul.f32 %v3271_v56, %v2668_v26 }
 0x150   : > { %v1071_v45 = vmax.f32 %v815_v4, 0.0  ;;  %v1057_v35 = vmax.f32 %v801_v44, 0.0  ;;  %v832_v29 = vadd.f32 %v2687_v1, %v480_v43  ;;  %v498_v41 = vmul.f32 %v3271_v56, %v2666_v25 }
 0x151   : > { %v2193_v15 = vpack.c.bf16 %v1074_v33, %v1058_v54  ;;  %v1073_v63 = vmax.f32 %v817_v55, 0.0  ;;  %v848_v7 = vadd.f32 %v2685_v0, %v496_v37  ;;  %v834_v62 = vadd.f32 %v2687_v1, %v482_v12 }
 0x152   : > { %v2163_v58 = vpack.c.bf16 %v1071_v45, %v1055_v30  ;;  %v1088_v21 = vmax.f32 %v832_v29, 0.0  ;;  %v479_v50 = vmul.f32 %v3275_v46, %v2668_v26  ;;  %v850_v38 = vadd.f32 %v2685_v0, %v498_v41 }
 0x153   : > { %2194 = vmatprep.subr.bf16.mxu1 %v2193_v15  ;;  %v2195_v16 = vpack.c.bf16 %v1073_v63, %v1057_v35  ;;  %v1104_v19 = vmax.f32 %v848_v7, 0.0  ;;  %v495_v10 = vmul.f32 %v3275_v46, %v2666_v25  ;;  %v1090_v47 = vmax.f32 %v834_v62, 0.0 }
 0x154   : > { %2164 = vmatpush1.bf16.msra.mxu0 %v2163_v58  ;;  %v831_v59 = vadd.f32 %v2687_v1, %v479_v50  ;;  %v481_v57 = vmul.f32 %v3288_v53, %v2668_v26  ;;  %v497_v24 = vmul.f32 %v3288_v53, %v2666_v25  ;;  %v1106_v2 = vmax.f32 %v850_v38, 0.0 }
 0x155   : > { %2196 = vmatpush1.bf16.msra.mxu1 %v2195_v16  ;;  %v2165_v11 = vpack.c.bf16 %v1104_v19, %v1088_v21  ;;  %v847_v13 = vadd.f32 %v2685_v0, %v495_v10  ;;  %v512_v51 = vmul.f32 %v3588_v5, %v2704_v32  ;;  %v528_v54 = vmul.f32 %v3588_v5, %v2702_v31 }
 0x156   : > { %v1087_v39 = vmax.f32 %v831_v59, 0.0  ;;  %v833_v20 = vadd.f32 %v2687_v1, %v481_v57  ;;  %v849_v23 = vadd.f32 %v2685_v0, %v497_v24  ;;  %v2197_v26 = vpack.c.bf16 %v1106_v2, %v1090_v47 }
 0x157   : > { %2166 = vmatprep.subr.bf16.mxu0 %v2165_v11  ;;  %v1103_v4 = vmax.f32 %v847_v13, 0.0  ;;  %v864_v25 = vadd.f32 %v2723_v18, %v512_v51  ;;  %v514_v44 = vmul.f32 %v3271_v56, %v2704_v32  ;;  %v880_v30 = vadd.f32 %v2721_v8, %v528_v54 }
 0x158   : > { %v1089_v43 = vmax.f32 %v833_v20, 0.0  ;;  %v1105_v33 = vmax.f32 %v849_v23, 0.0  ;;  %v530_v1 = vmul.f32 %v3271_v56, %v2702_v31  ;;  %2198 = vmatprep.subr.bf16.mxu1 %v2197_v26  ;;  %v511_v45 = vmul.f32 %v3275_v46, %v2704_v32 }
 0x159   : > { %v2167_v0 = vpack.c.bf16 %v1103_v4, %v1087_v39  ;;  %v1120_v55 = vmax.f32 %v864_v25, 0.0  ;;  %v866_v37 = vadd.f32 %v2723_v18, %v514_v44  ;;  %v1136_v29 = vmax.f32 %v880_v30, 0.0 }
 0x15a   : > { %v2199_v35 = vpack.c.bf16 %v1105_v33, %v1089_v43  ;;  %v882_v12 = vadd.f32 %v2721_v8, %v530_v1  ;;  %v527_v15 = vmul.f32 %v3275_v46, %v2702_v31  ;;  %v863_v7 = vadd.f32 %v2723_v18, %v511_v45 }
 0x15b   : > { %2168 = vmatpush1.bf16.msra.mxu0 %v2167_v0  ;;  %v1122_v63 = vmax.f32 %v866_v37, 0.0  ;;  %v513_v41 = vmul.f32 %v3288_v53, %v2704_v32  ;;  %v529_v58 = vmul.f32 %v3288_v53, %v2702_v31  ;;  %v2169_v21 = vpack.c.bf16 %v1136_v29, %v1120_v55 }
 0x15c   : > { %2200 = vmatpush1.bf16.msra.mxu1 %v2199_v35  ;;  %v1138_v62 = vmax.f32 %v882_v12, 0.0  ;;  %v879_v50 = vadd.f32 %v2721_v8, %v527_v15  ;;  %v544_v16 = vmul.f32 %v3588_v5, %v2744_v42  ;;  %v1119_v19 = vmax.f32 %v863_v7, 0.0 }
 0x15d   : > { %v865_v38 = vadd.f32 %v2723_v18, %v513_v41  ;;  %v881_v10 = vadd.f32 %v2721_v8, %v529_v58  ;;  %v560_v47 = vmul.f32 %v3588_v5, %v2742_v40  ;;  %2170 = vmatprep.subr.bf16.mxu0 %v2169_v21  ;;  %v546_v57 = vmul.f32 %v3271_v56, %v2744_v42 }
 0x15e   : > { %v2201_v32 = vpack.c.bf16 %v1138_v62, %v1122_v63  ;;  %v1135_v59 = vmax.f32 %v879_v50, 0.0  ;;  %v896_v31 = vadd.f32 %v2763_v36, %v544_v16  ;;  %v562_v18 = vmul.f32 %v3271_v56, %v2742_v40 }
 0x15f   : > { %v1121_v24 = vmax.f32 %v865_v38, 0.0  ;;  %v1137_v11 = vmax.f32 %v881_v10, 0.0  ;;  %v912_v2 = vadd.f32 %v2761_v34, %v560_v47  ;;  %v898_v51 = vadd.f32 %v2763_v36, %v546_v57 }
 0x160   : > { %2202 = vmatprep.subr.bf16.mxu1 %v2201_v32  ;;  %v2171_v8 = vpack.c.bf16 %v1135_v59, %v1119_v19  ;;  %v1152_v13 = vmax.f32 %v896_v31, 0.0  ;;  %v543_v39 = vmul.f32 %v3275_v46, %v2744_v42  ;;  %v914_v54 = vadd.f32 %v2761_v34, %v562_v18 }
 0x161   : > { %v2203_v20 = vpack.c.bf16 %v1137_v11, %v1121_v24  ;;  %v1168_v23 = vmax.f32 %v912_v2, 0.0  ;;  %v559_v26 = vmul.f32 %v3275_v46, %v2742_v40  ;;  %v1154_v4 = vmax.f32 %v898_v51, 0.0 }
 0x162   : > { %2172 = vmatpush1.bf16.msra.mxu0 %v2171_v8  ;;  %v895_v25 = vadd.f32 %v2763_v36, %v543_v39  ;;  %v545_v44 = vmul.f32 %v3288_v53, %v2744_v42  ;;  %v561_v43 = vmul.f32 %v3288_v53, %v2742_v40  ;;  %v1170_v30 = vmax.f32 %v914_v54, 0.0 }
 0x163   : > { %2204 = vmatpush1.bf16.msra.mxu1 %v2203_v20  ;;  %v2173_v33 = vpack.c.bf16 %v1168_v23, %v1152_v13  ;;  %v911_v1 = vadd.f32 %v2761_v34, %v559_v26  ;;  %v576_v0 = vmul.f32 %v3588_v5, %v2783_v3  ;;  %v592_v35 = vmul.f32 %v3588_v5, %v2781_v49 }
 0x164   : > { %v1151_v55 = vmax.f32 %v895_v25, 0.0  ;;  %v897_v37 = vadd.f32 %v2763_v36, %v545_v44  ;;  %v913_v45 = vadd.f32 %v2761_v34, %v561_v43  ;;  %v2205_v42 = vpack.c.bf16 %v1170_v30, %v1154_v4 }
 0x165   : > { %2174 = vmatprep.subr.bf16.mxu0 %v2173_v33  ;;  %v1167_v29 = vmax.f32 %v911_v1, 0.0  ;;  %v928_v40 = vadd.f32 %v2802_v22, %v576_v0  ;;  %v578_v12 = vmul.f32 %v3271_v56, %v2783_v3  ;;  %v944_v7 = vadd.f32 %v2800_v48, %v592_v35 }
 0x166   : > { %v1153_v15 = vmax.f32 %v897_v37, 0.0  ;;  %v1169_v63 = vmax.f32 %v913_v45, 0.0  ;;  %v594_v36 = vmul.f32 %v3271_v56, %v2781_v49  ;;  %2206 = vmatprep.subr.bf16.mxu1 %v2205_v42  ;;  %v575_v21 = vmul.f32 %v3275_v46, %v2783_v3 }
 0x167   : > { %v2175_v34 = vpack.c.bf16 %v1167_v29, %v1151_v55  ;;  %v1184_v41 = vmax.f32 %v928_v40, 0.0  ;;  %v930_v58 = vadd.f32 %v2802_v22, %v578_v12  ;;  %v1200_v50 = vmax.f32 %v944_v7, 0.0 }
 0x168   : > { %v2207_v62 = vpack.c.bf16 %v1169_v63, %v1153_v15  ;;  %v946_v16 = vadd.f32 %v2800_v48, %v594_v36  ;;  %v591_v19 = vmul.f32 %v3275_v46, %v2781_v49  ;;  %v927_v10 = vadd.f32 %v2802_v22, %v575_v21 }
 0x169   : > { %2176 = vmatpush1.bf16.msra.mxu0 %v2175_v34  ;;  %v1186_v38 = vmax.f32 %v930_v58, 0.0  ;;  %v577_v47 = vmul.f32 %v3288_v53, %v2783_v3  ;;  %v593_v32 = vmul.f32 %v3288_v53, %v2781_v49  ;;  %v2177_v59 = vpack.c.bf16 %v1200_v50, %v1184_v41 }
 0x16a   : > { %2208 = vmatpush1.bf16.msra.mxu1 %v2207_v62  ;;  %v1202_v31 = vmax.f32 %v946_v16, 0.0  ;;  %v943_v57 = vadd.f32 %v2800_v48, %v591_v19  ;;  %v608_v24 = vmul.f32 %v3588_v5, %v2821_v28  ;;  %v1183_v11 = vmax.f32 %v927_v10, 0.0 }
 0x16b   : > { %v929_v2 = vadd.f32 %v2802_v22, %v577_v47  ;;  %v945_v18 = vadd.f32 %v2800_v48, %v593_v32  ;;  %v624_v8 = vmul.f32 %v3588_v5, %v2819_v6  ;;  %2178 = vmatprep.subr.bf16.mxu0 %v2177_v59  ;;  %v610_v51 = vmul.f32 %v3271_v56, %v2821_v28 }
 0x16c   : > { %v2209_v3 = vpack.c.bf16 %v1202_v31, %v1186_v38  ;;  %v1199_v13 = vmax.f32 %v943_v57, 0.0  ;;  %v960_v49 = vadd.f32 %v2839_v17, %v608_v24  ;;  %v626_v22 = vmul.f32 %v3271_v56, %v2819_v6 }
 0x16d   : > { %v1185_v39 = vmax.f32 %v929_v2, 0.0  ;;  %v1201_v20 = vmax.f32 %v945_v18, 0.0  ;;  %v976_v23 = vadd.f32 %v2837_v27, %v624_v8  ;;  %v962_v26 = vadd.f32 %v2839_v17, %v610_v51 }
 0x16e   : > { %2210 = vmatprep.subr.bf16.mxu1 %v2209_v3  ;;  %v2179_v48 = vpack.c.bf16 %v1199_v13, %v1183_v11  ;;  %v1216_v54 = vmax.f32 %v960_v49, 0.0  ;;  %v607_v4 = vmul.f32 %v3275_v46, %v2821_v28  ;;  %v978_v43 = vadd.f32 %v2837_v27, %v626_v22 }
 0x16f   : > { %v2211_v25 = vpack.c.bf16 %v1201_v20, %v1185_v39  ;;  %v1232_v44 = vmax.f32 %v976_v23, 0.0  ;;  %v623_v33 = vmul.f32 %v3275_v46, %v2819_v6  ;;  %v1218_v30 = vmax.f32 %v962_v26, 0.0 }
 0x170   : > { %2180 = vmatpush1.bf16.msra.mxu0 %v2179_v48  ;;  %v959_v1 = vadd.f32 %v2839_v17, %v607_v4  ;;  %v609_v0 = vmul.f32 %v3288_v53, %v2821_v28  ;;  %v625_v55 = vmul.f32 %v3288_v53, %v2819_v6  ;;  %v1234_v45 = vmax.f32 %v978_v43, 0.0 }
 0x171   : > { %2212 = vmatpush1.bf16.msra.mxu1 %v2211_v25  ;;  %v2181_v37 = vpack.c.bf16 %v1232_v44, %v1216_v54  ;;  %v975_v35 = vadd.f32 %v2837_v27, %v623_v33  ;;  %v640_v42 = vmul.f32 %v3588_v5, %v2856_v61  ;;  %v656_v15 = vmul.f32 %v3588_v5, %v2854_v14 }
 0x172   : > { %v1215_v29 = vmax.f32 %v959_v1, 0.0  ;;  %v961_v40 = vadd.f32 %v2839_v17, %v609_v0  ;;  %v977_v12 = vadd.f32 %v2837_v27, %v625_v55  ;;  %v2213_v28 = vpack.c.bf16 %v1234_v45, %v1218_v30 }
 0x173   : > { %2182 = vmatprep.subr.bf16.mxu0 %v2181_v37  ;;  %v1231_v63 = vmax.f32 %v975_v35, 0.0  ;;  %v992_v6 = vadd.f32 %v2875_v60, %v640_v42  ;;  %v642_v7 = vmul.f32 %v3271_v56, %v2856_v61  ;;  %v1008_v41 = vadd.f32 %v2873_v9, %v656_v15 }
 0x174   : > { %v1217_v36 = vmax.f32 %v961_v40, 0.0  ;;  %v1233_v34 = vmax.f32 %v977_v12, 0.0  ;;  %v658_v17 = vmul.f32 %v3271_v56, %v2854_v14  ;;  %2214 = vmatprep.subr.bf16.mxu1 %v2213_v28  ;;  %v639_v21 = vmul.f32 %v3275_v46, %v2856_v61 }
 0x175   : > { %v2183_v27 = vpack.c.bf16 %v1231_v63, %v1215_v29  ;;  %v1248_v58 = vmax.f32 %v992_v6, 0.0  ;;  %v994_v5 = vadd.f32 %v2875_v60, %v642_v7  ;;  %v1264_v50 = vmax.f32 %v1008_v41, 0.0 }
 0x176   : > { %v2215_v62 = vpack.c.bf16 %v1233_v34, %v1217_v36  ;;  %v1010_v16 = vadd.f32 %v2873_v9, %v658_v17  ;;  %v655_v19 = vmul.f32 %v3275_v46, %v2854_v14  ;;  %v991_v10 = vadd.f32 %v2875_v60, %v639_v21 }
 0x177   : > { %2184 = vmatpush1.bf16.msra.mxu0 %v2183_v27  ;;  %v1250_v38 = vmax.f32 %v994_v5, 0.0  ;;  %v641_v56 = vmul.f32 %v3288_v53, %v2856_v61  ;;  %v657_v47 = vmul.f32 %v3288_v53, %v2854_v14  ;;  %v2185_v32 = vpack.c.bf16 %v1264_v50, %v1248_v58  ;;  %v1272_v53 = vpop.permute.xlu0 %1271 }
 0x178   : > { %2216 = vmatpush1.bf16.msra.mxu1 %v2215_v62  ;;  %v1266_v59 = vmax.f32 %v1010_v16, 0.0  ;;  %v1007_v31 = vadd.f32 %v2873_v9, %v655_v19  ;;  %v1247_v57 = vmax.f32 %v991_v10, 0.0 }
 0x179   : > { %v993_v24 = vadd.f32 %v2875_v60, %v641_v56  ;;  %v1009_v46 = vadd.f32 %v2873_v9, %v657_v47  ;;  %2186 = vmatprep.subr.bf16.mxu0 %v2185_v32 }
 0x17a   : > { %v2217_v11 = vpack.c.bf16 %v1266_v59, %v1250_v38  ;;  %v1263_v2 = vmax.f32 %v1007_v31, 0.0 }
 0x17b   : > { %v1249_v18 = vmax.f32 %v993_v24, 0.0  ;;  %v1265_v61 = vmax.f32 %v1009_v46, 0.0 }
 0x17c   : > { %2218 = vmatprep.subr.bf16.mxu1 %v2217_v11  ;;  %v2187_v8 = vpack.c.bf16 %v1263_v2, %v1247_v57 }
 0x17d   : > { %v2219_v14 = vpack.c.bf16 %v1265_v61, %v1249_v18 }
 0x17e   : > { %2188 = vmatpush1.bf16.msra.mxu0 %v2187_v8 }
 0x17f   : > { %2220 = vmatpush1.bf16.msra.mxu1 %v2219_v14 }
 0x181   : > { %1765 = vmatmul.mubr.f32.vlgmr.msra.gmra.mrb[6].mxu0 %v3309_v52 }
 0x182   : > { %1836 = vmatmul.mubr.f32.vlgmr.msra.gmra.mrb[6].mxu1 %v3309_v52 }
 0x1b0   : > { %v1340_v60 = vpop.f32.mrb[0].mxu0  ;;  %v1411_v3 = vpop.f32.mrb[0].mxu1 }
 0x1b1   : > { %v1341_v9 = vadd.f32 %v1340_v60, %v1272_v53  ;;  %v1412_v13 = vadd.f32 %v1411_v3, %v1272_v53  ;;  %v1342_v49 = vpop.f32.mrb[1].mxu0  ;;  %v1413_v51 = vpop.f32.mrb[1].mxu1 }
 0x1b2   : > { %v1343_v39 = vadd.f32 %v1342_v49, %v1272_v53  ;;  %v1414_v20 = vadd.f32 %v1413_v51, %v1272_v53 }
 0x1b4   : > { %v1858_v23 = vcombine.low %v1341_v9, %v1343_v39  ;;  %v1859_v22 = vcombine.low %v1412_v13, %v1414_v20 }
 0x1b6   : > { %1874 = vst [vmem:[%s3482_s25] sm:$0xff] %v1858_v23  ;;  %1875 = vst [vmem:[%s3482_s25 + $0x8] sm:$0xff] %v1859_v22 }
 0x1e2   : > { %v1482_v52 = vpop.f32.mrb[2].mxu0 }
 0x1e3   : > { %v1483_v48 = vadd.f32 %v1482_v52, %v1272_v53  ;;  %v1484_v54 = vpop.f32.mrb[3].mxu0 }
 0x1e4   : > { %v1553_v26 = vpop.f32.mrb[2].mxu1  ;;  %v1485_v4 = vadd.f32 %v1484_v54, %v1272_v53 }
 0x1e5   : > { %v1554_v25 = vadd.f32 %v1553_v26, %v1272_v53  ;;  %v1555_v44 = vpop.f32.mrb[3].mxu1 }
 0x1e6   : > { %v1860_v43 = vcombine.low %v1483_v48, %v1485_v4  ;;  %v1556_v33 = vadd.f32 %v1555_v44, %v1272_v53 }
 0x1e8   : > { %1876 = vst [vmem:[%s3482_s25 + $0x10] sm:$0xff] %v1860_v43  ;;  %v1861_v30 = vcombine.low %v1554_v25, %v1556_v33 }
 0x1ea   : > { %1877 = vst [vmem:[%s3482_s25 + $0x18] sm:$0xff] %v1861_v30 }
 0x21a   : > { %v1624_v1 = vpop.f32.mrb[4].mxu0 }
 0x21b   : > { %v1625_v0 = vadd.f32 %v1624_v1, %v1272_v53  ;;  %v1626_v55 = vpop.f32.mrb[5].mxu0  ;;  %v1695_v37 = vpop.f32.mrb[4].mxu1 }
 0x21c   : > { %v1627_v45 = vadd.f32 %v1626_v55, %v1272_v53  ;;  %v1696_v35 = vadd.f32 %v1695_v37, %v1272_v53  ;;  %v1697_v42 = vpop.f32.mrb[5].mxu1 }
 0x21d   : > { %v1698_v40 = vadd.f32 %v1697_v42, %v1272_v53 }
 0x21e   : > { %v1862_v29 = vcombine.low %v1625_v0, %v1627_v45 }
 0x21f   : > { %v1863_v12 = vcombine.low %v1696_v35, %v1698_v40 }
 0x220   : > { %1878 = vst [vmem:[%s3482_s25 + $0x20] sm:$0xff] %v1862_v29 }
 0x221   : > { %1879 = vst [vmem:[%s3482_s25 + $0x28] sm:$0xff] %v1863_v12 }
 0x254   : > { %v1766_v15 = vpop.f32.mrb[6].mxu0 }
 0x255   : > { %v1767_v28 = vadd.f32 %v1766_v15, %v1272_v53  ;;  %v1837_v63 = vpop.f32.mrb[6].mxu1  ;;  %v1768_v6 = vpop.f32.mrb[7].mxu0 }
 0x256   : > { %v1838_v7 = vadd.f32 %v1837_v63, %v1272_v53  ;;  %v1769_v36 = vadd.f32 %v1768_v6, %v1272_v53  ;;  %v1839_v34 = vpop.f32.mrb[7].mxu1 }
 0x257   : > { %v1840_v41 = vadd.f32 %v1839_v34, %v1272_v53 }
 0x258   : > { %v1864_v17 = vcombine.low %v1767_v28, %v1769_v36 }
 0x259   : > { %v1865_v27 = vcombine.low %v1838_v7, %v1840_v41 }
 0x25a   : > { %1880 = vst [vmem:[%s3482_s25 + $0x30] sm:$0xff] %v1864_v17 }
 0x25b   : > { %1881 = vst [vmem:[%s3482_s25 + $0x38] sm:$0xff] %v1865_v27 }
 0x25c   : > { %2279 = shalt.err (!%p2276_p3)
}
 0x25d   : > { %s2280_s14 = scalar_lea.hbm %s3495_s9, 1024  ;;  %s2284_s16 = scalar_lea.hbm %s3546_s5, 2048 }
 0x25e   : > { %p2281_p4 = scmp.ne.s32.totalorder %s3495_s9, %s2280_s14  ;;  %p2285_p9 = scmp.lt.u32.totalorder %s3495_s9, %s3546_s5 }
 0x25f   : > { %p2286_p10 = scmp.lt.u32.totalorder %s2284_s16, %s2280_s14  ;;  %p2288_p12 = scmp.lt.u32.totalorder %s2280_s14, %s3495_s9 }
 0x260   : > { %p2282_p7 = pnand %p2281_p4, %p2401_p5 }
 0x261   : > { %p2287_p11 = por %p2286_p10, %p2285_p9 }
 0x262   : > { %p2283_p8 = pneg %p2282_p7 }
 0x263   : > { %p2289_p13 = por %p2288_p12, %p2287_p11 }
 0x265   : > { %p2290_p0 = pnand %p2289_p13, %p2283_p8 }
 0x267   : > { %2293 = shalt.err (!%p2290_p0)
}
 0x268   : > { %2221 = dma.vmem_to_hbm [thread:$0]  (%p2401_p5), %s3497_s6, 1024, %s3495_s9, %s1883_s10  }
 0x269 PF: > { %p2227_p1 = scmp.ge.s32.totalorder %s2328_s21, 2  ;;  %s1909_s25 = sand.u32 1, %s2316_s18  }
 0x26a   : > { %s1910_s30 = scalar_lea.sflag [#allocation3], %s1909_s25 }
 0x26b   : > { %p2224_p2 = pnand %p2227_p1, %p2405_p6 }
 0x26d   : > { %2311 = dma.done.wait (!%p2224_p2), %s1910_s30, 1024  }
 0x26e   : > { %2313 = vsyncadd (!%p2224_p2), %s1910_s30, 4294966272  ;;  %p15_p3 = scmp.ge.s32.totalorder %s2388_s24, 4   ;;  %s3593_s18 = smov %s2320_s19 }
 0x26f   : > { %s3594_s19 = smov %s2324_s20  ;;  %s3595_s20 = smov %s2399_s27 }
 0x270   : > { %s3596_s21 = smov %s2388_s24  ;;  %17 = sbr.rel (!%p15_p3) target bundleno = 3 (0x3), region = 75 }
 0x277   :  { %1915 = vsyncpa [#allocation3], 1 }
 0x278   :  { %1917 = vsyncpa [#allocation3 + $0x1], 1 }

</bundles_post_ra>
